<compile_context>
chip_gen: v6e
topology: v6e:2x2x1
jax: 0.10.0
libtpu: 0.0.40
codegen_flags: <defaults>
</compile_context>

<pallas_src>
import functools

import jax
import jax.numpy as jnp
from jax import lax
from jax.experimental import pallas as pl
from jax.experimental.pallas import tpu as pltpu


def _self_attn_kernel(x_ref, wcat_ref, bcat_ref, gamma_ref,
                      out_ref, attn_ref,
                      q_sc, kt_sc, v_sc,
                      *, C, C8p, TR):
    r = pl.program_id(1)

    # ---- per-batch prologue: fused QKV projection, computed once ----------
    @pl.when(r == 0)
    def _project():
        x = x_ref[0]                                                   # (C, N)
        qkv = jnp.dot(wcat_ref[...], x,
                      preferred_element_type=jnp.float32)              # (C2, N)
        qkv = qkv + bcat_ref[...]                                      # bias (C2,1) bcast over lanes
        v_sc[...] = qkv[:C, :]                                         # (C,   N)
        q_sc[...] = qkv[C:C + C8p, :]                                  # (C8p, N)
        kt_sc[...] = qkv[C + C8p:, :].T                                # (N, C8p) one small transpose / batch

    # ---- per row-tile attention --------------------------------------------
    row0 = pl.multiple_of(r * TR, TR)
    kt_tile = kt_sc[pl.ds(row0, TR), :]                                # (TR, C8p)

    # scores[a, b] = K_a . Q_b  — directly in returned-attention orientation
    s = jnp.dot(kt_tile, q_sc[...],
                preferred_element_type=jnp.float32)                    # (TR, N)

    # softmax over the lane axis (== torch softmax(dim=-2) after the permute)
    m = jnp.max(s, axis=-1, keepdims=True)
    p = jnp.exp(s - m)
    denom = jnp.sum(p, axis=-1, keepdims=True)
    attn = p * pl.reciprocal(denom, approx=True)                       # (TR, N)
    attn_ref[0] = attn                                                 # lane-dense store (width N)

    # o[c, a] = sum_j V[c, j] * attn[a, j]   (NT matmul, no explicit transpose)
    o = lax.dot_general(v_sc[...], attn, (((1,), (1,)), ((), ())),
                        preferred_element_type=jnp.float32)            # (C, TR)

    g = gamma_ref[0]
    out_ref[0] = x_ref[0, :, pl.ds(row0, TR)] + g * o                  # lane-dense store (width TR)


def _pick_row_tile(n):
    for tr in (512, 256, 128):
        if n % tr == 0:
            return tr
    return n  # fall back to a full-extent block


def self_attention_forward(x, wq, bq, wk, bk, wv, bv, gamma):
    """x: (B, C, H, W) float32.  Returns (out NCHW, attention_map (B, N, N))."""
    B, C, H, W = x.shape
    N = H * W
    C8 = wq.shape[0]
    assert C % 8 == 0, "in_dim must be a multiple of 8 for this kernel"

    # Pad query/key channel count to a sublane multiple; padded channels have
    # zero weight & bias so they contribute nothing to the attention scores.
    C8p = max(8, ((C8 + 7) // 8) * 8)
    C2 = C + 2 * C8p
    TR = _pick_row_tile(N)
    NT = N // TR

    f32 = jnp.float32
    xf = x.reshape(B, C, N).astype(f32)          # NCHW -> (B, C, N): free reshape

    wq_p = jnp.pad(wq.astype(f32), ((0, C8p - C8), (0, 0)))
    wk_p = jnp.pad(wk.astype(f32), ((0, C8p - C8), (0, 0)))
    bq_p = jnp.pad(bq.astype(f32), (0, C8p - C8))
    bk_p = jnp.pad(bk.astype(f32), (0, C8p - C8))
    wcat = jnp.concatenate([wv.astype(f32), wq_p, wk_p], axis=0)       # (C2, C)
    bcat = jnp.concatenate([bv.astype(f32), bq_p, bk_p]).reshape(C2, 1)
    g1 = jnp.asarray(gamma, f32).reshape(1,)

    # Rough VMEM budget: double-buffered blocks + scratch + matmul temporaries.
    est = 4 * (2 * C * N + 2 * C2 * C + 2 * C * TR + 2 * TR * N
               + (C + C8p) * N + 128 * N + C2 * N + 4 * TR * N)
    vmem_limit = int(min(max(est + (4 << 20), 32 << 20), 64 << 20))

    kernel = functools.partial(_self_attn_kernel, C=C, C8p=C8p, TR=TR)

    out_f, attn = pl.pallas_call(
        kernel,
        out_shape=(
            jax.ShapeDtypeStruct((B, C, N), f32),
            jax.ShapeDtypeStruct((B, N, N), f32),
        ),
        grid_spec=pltpu.PrefetchScalarGridSpec(
            num_scalar_prefetch=0,
            grid=(B, NT),
            in_specs=[
                pl.BlockSpec((1, C, N), lambda b, r: (b, 0, 0)),    # x (per-batch, resident over r)
                pl.BlockSpec((C2, C), lambda b, r: (0, 0)),         # fused [Wv; Wq; Wk] (loaded once)
                pl.BlockSpec((C2, 1), lambda b, r: (0, 0)),         # fused bias
                pl.BlockSpec(memory_space=pltpu.MemorySpace.SMEM),  # gamma scalar
            ],
            out_specs=(
                pl.BlockSpec((1, C, TR), lambda b, r: (b, 0, r)),   # out, lane-dense (TR)
                pl.BlockSpec((1, TR, N), lambda b, r: (b, r, 0)),   # attention rows, lane-dense (N)
            ),
            scratch_shapes=[
                pltpu.VMEM((C8p, N), f32),   # Q
                pltpu.VMEM((N, C8p), f32),   # K^T
                pltpu.VMEM((C, N), f32),     # V
            ],
        ),
        compiler_params=pltpu.CompilerParams(
            dimension_semantics=("parallel", "arbitrary"),
            vmem_limit_bytes=vmem_limit,
        ),
    )(xf, wcat, bcat, g1)

    out = out_f.reshape(B, C, H, W)
    return out, attn


def _reference_forward(x, wq, bq, wk, bk, wv, bv, gamma):
    """Pure-JAX mirror of the PyTorch forward (for verification)."""
    B, C, H, W = x.shape
    N = H * W
    xflat = x.reshape(B, C, N)
    q = jnp.einsum("oc,bcn->bon", wq, xflat) + bq[None, :, None]      # (B, C8, N)
    k = jnp.einsum("oc,bcn->bon", wk, xflat) + bk[None, :, None]      # (B, C8, N)
    v = jnp.einsum("oc,bcn->bon", wv, xflat) + bv[None, :, None]      # (B, C,  N)
    s = jnp.einsum("bci,bcj->bij", q, k)                              # (B, N, N)
    attn_t = jax.nn.softmax(s, axis=-2)                               # softmax over dim -2
    attn = jnp.transpose(attn_t, (0, 2, 1))
    o = jnp.einsum("bcj,bjk->bck", v, attn_t).reshape(B, C, H, W)
    out = x + gamma * o
    return out, attn


if __name__ == "__main__":
    B, C, H, W = 2, 32, 16, 16        # in_dim = 32 -> query/key channels = 4; N = 256
    C8 = C // 8

    key = jax.random.PRNGKey(0)
    kx, k1, k2, k3, k4, k5, k6 = jax.random.split(key, 7)

    x = jax.random.normal(kx, (B, C, H, W), dtype=jnp.float32)
    # Conv2d(k=1) weights: (out_ch, in_ch) after dropping the 1x1 spatial dims.
    wq = jax.random.normal(k1, (C8, C), dtype=jnp.float32) * 0.2
    bq = jax.random.normal(k2, (C8,), dtype=jnp.float32) * 0.05
    wk = jax.random.normal(k3, (C8, C), dtype=jnp.float32) * 0.2
    bk = jax.random.normal(k4, (C8,), dtype=jnp.float32) * 0.05
    wv = jax.random.normal(k5, (C, C), dtype=jnp.float32) * 0.2
    bv = jax.random.normal(k6, (C,), dtype=jnp.float32) * 0.05
    # nn.Parameter(torch.zeros(1)) in __init__; use a nonzero value so the
    # residual-add path is actually exercised.
    gamma = jnp.float32(0.5)

    out, attn = jax.block_until_ready(
        self_attention_forward(x, wq, bq, wk, bk, wv, bv, gamma))

    out_ref, attn_ref = _reference_forward(x, wq, bq, wk, bk, wv, bv, gamma)
    assert out.shape == (B, C, H, W) and attn.shape == (B, H * W, H * W)
    assert jnp.allclose(out, out_ref, atol=2e-3, rtol=2e-3)
    assert jnp.allclose(attn, attn_ref, atol=2e-3, rtol=2e-3)

    print("KERNEL_OK")
</pallas_src>

<mosaic_0001>
module attributes {stable_mosaic.version = 11 : i64} {
  func.func @_self_attn_kernel(%arg0: i32, %arg1: i32, %arg2: memref<1x32x256xf32, #tpu.memory_space<vmem>>, %arg3: memref<48x32xf32, #tpu.memory_space<vmem>>, %arg4: memref<48x1xf32, #tpu.memory_space<vmem>>, %arg5: memref<1xf32, #tpu.memory_space<smem>>, %arg6: memref<1x32x256xf32, #tpu.memory_space<vmem>>, %arg7: memref<1x256x256xf32, #tpu.memory_space<vmem>>, %arg8: memref<8x256xf32, #tpu.memory_space<vmem>>, %arg9: memref<256x8xf32, #tpu.memory_space<vmem>>, %arg10: memref<32x256xf32, #tpu.memory_space<vmem>>) attributes {dimension_semantics = [#tpu.dimension_semantics<parallel>, #tpu.dimension_semantics<arbitrary>], iteration_bounds = array<i64: 2, 1>, scalar_prefetch = 0 : i64, scratch_operands = 3 : i64, tpu.core_type = #tpu.core_type<tc>, window_params = [{transform_indices = @transform_0, window_bounds = array<i64: 1, 32, 256>}, {pipeline_mode = #tpu.pipeline_mode<synchronous>, transform_indices = @transform_1, window_bounds = array<i64: 48, 32>}, {pipeline_mode = #tpu.pipeline_mode<synchronous>, transform_indices = @transform_2, window_bounds = array<i64: 48, 1>}, {transform_indices = @transform_3, window_bounds = array<i64: 1>}, {transform_indices = @transform_4, window_bounds = array<i64: 1, 32, 256>}, {transform_indices = @transform_5, window_bounds = array<i64: 1, 256, 256>}]} {
    %c0_i32 = arith.constant 0 : i32
    %0 = arith.cmpi eq, %arg1, %c0_i32 : i32
    %1 = arith.extui %0 : i1 to i32
    %c0_i32_0 = arith.constant 0 : i32
    %2 = arith.cmpi ne, %1, %c0_i32_0 : i32
    scf.if %2 {
      %c0_17 = arith.constant 0 : index
      %c0_18 = arith.constant 0 : index
      %c0_19 = arith.constant 0 : index
      %34 = vector.load %arg2[%c0_17, %c0_18, %c0_19] : memref<1x32x256xf32, #tpu.memory_space<vmem>>, vector<1x32x256xf32>
      %35 = vector.shape_cast %34 : vector<1x32x256xf32> to vector<32x256xf32>
      %c0_20 = arith.constant 0 : index
      %c0_21 = arith.constant 0 : index
      %36 = vector.load %arg3[%c0_20, %c0_21] : memref<48x32xf32, #tpu.memory_space<vmem>>, vector<48x32xf32>
      %cst_22 = arith.constant dense<0.000000e+00> : vector<48x256xf32>
      %37 = tpu.matmul %36, %35, %cst_22 {dimension_numbers = #tpu.dot_dimension_numbers<[1], [0], [0], [1], [0, 0, 1, 1], [], []>} : vector<48x32xf32>, vector<32x256xf32>, vector<48x256xf32> -> vector<48x256xf32>
      %c0_23 = arith.constant 0 : index
      %c0_24 = arith.constant 0 : index
      %38 = vector.load %arg4[%c0_23, %c0_24] : memref<48x1xf32, #tpu.memory_space<vmem>>, vector<48x1xf32>
      %39 = vector.broadcast %38 : vector<48x1xf32> to vector<48x256xf32>
      %40 = arith.addf %37, %39 : vector<48x256xf32>
      %41 = vector.extract_strided_slice %40 {offsets = [0, 0], sizes = [32, 256], strides = [1, 1]} : vector<48x256xf32> to vector<32x256xf32>
      %c0_25 = arith.constant 0 : index
      %c0_26 = arith.constant 0 : index
      %42 = vector.load %arg10[%c0_25, %c0_26] : memref<32x256xf32, #tpu.memory_space<vmem>>, vector<32x256xf32>
      tpu.vector_store %arg10[%c0_25, %c0_26], %41 {strides = array<i32>} : memref<32x256xf32, #tpu.memory_space<vmem>>, vector<32x256xf32>,
      %43 = vector.extract_strided_slice %40 {offsets = [32, 0], sizes = [8, 256], strides = [1, 1]} : vector<48x256xf32> to vector<8x256xf32>
      %c0_27 = arith.constant 0 : index
      %c0_28 = arith.constant 0 : index
      %44 = vector.load %arg8[%c0_27, %c0_28] : memref<8x256xf32, #tpu.memory_space<vmem>>, vector<8x256xf32>
      tpu.vector_store %arg8[%c0_27, %c0_28], %43 {strides = array<i32>} : memref<8x256xf32, #tpu.memory_space<vmem>>, vector<8x256xf32>,
      %45 = vector.extract_strided_slice %40 {offsets = [40, 0], sizes = [8, 256], strides = [1, 1]} : vector<48x256xf32> to vector<8x256xf32>
      %46 = tpu.transpose %45, [1, 0] : vector<8x256xf32> -> vector<256x8xf32>
      %c0_29 = arith.constant 0 : index
      %c0_30 = arith.constant 0 : index
      %47 = vector.load %arg9[%c0_29, %c0_30] : memref<256x8xf32, #tpu.memory_space<vmem>>, vector<256x8xf32>
      tpu.vector_store %arg9[%c0_29, %c0_30], %46 {strides = array<i32>} : memref<256x8xf32, #tpu.memory_space<vmem>>, vector<256x8xf32>,
    } else {
    }
    %c256_i32 = arith.constant 256 : i32
    %3 = arith.muli %arg1, %c256_i32 : i32
    %4 = tpu.assume_multiple %3, 256 : i32
    %5 = arith.index_cast %4 : i32 to index
    %c0 = arith.constant 0 : index
    %6 = vector.load %arg9[%5, %c0] : memref<256x8xf32, #tpu.memory_space<vmem>>, vector<256x8xf32>
    %c0_1 = arith.constant 0 : index
    %c0_2 = arith.constant 0 : index
    %7 = vector.load %arg8[%c0_1, %c0_2] : memref<8x256xf32, #tpu.memory_space<vmem>>, vector<8x256xf32>
    %cst = arith.constant dense<0.000000e+00> : vector<256x256xf32>
    %8 = tpu.matmul %6, %7, %cst {dimension_numbers = #tpu.dot_dimension_numbers<[1], [0], [0], [1], [0, 0, 1, 1], [], []>} : vector<256x8xf32>, vector<8x256xf32>, vector<256x256xf32> -> vector<256x256xf32>
    %cst_3 = arith.constant dense<0xFF800000> : vector<256xf32>
    %9 = vector.multi_reduction <maximumf>, %8, %cst_3 [1] : vector<256x256xf32> to vector<256xf32>
    %10 = vector.shape_cast %9 : vector<256xf32> to vector<256x1xf32>
    %11 = vector.broadcast %10 : vector<256x1xf32> to vector<256x256xf32>
    %12 = arith.subf %8, %11 : vector<256x256xf32>
    %13 = math.exp %12 : vector<256x256xf32>
    %cst_4 = arith.constant dense<0.000000e+00> : vector<256xf32>
    %14 = vector.multi_reduction <add>, %13, %cst_4 [1] : vector<256x256xf32> to vector<256xf32>
    %15 = vector.shape_cast %14 : vector<256xf32> to vector<256x1xf32>
    %16 = tpu.reciprocal %15 {approx = true} : vector<256x1xf32> -> vector<256x1xf32>
    %17 = vector.broadcast %16 : vector<256x1xf32> to vector<256x256xf32>
    %18 = arith.mulf %13, %17 : vector<256x256xf32>
    %c0_5 = arith.constant 0 : index
    %c0_6 = arith.constant 0 : index
    %c0_7 = arith.constant 0 : index
    %19 = vector.load %arg7[%c0_5, %c0_6, %c0_7] : memref<1x256x256xf32, #tpu.memory_space<vmem>>, vector<1x256x256xf32>
    %20 = vector.shape_cast %19 : vector<1x256x256xf32> to vector<256x256xf32>
    %21 = vector.shape_cast %18 : vector<256x256xf32> to vector<1x256x256xf32>
    tpu.vector_store %arg7[%c0_5, %c0_6, %c0_7], %21 {strides = array<i32>} : memref<1x256x256xf32, #tpu.memory_space<vmem>>, vector<1x256x256xf32>,
    %c0_8 = arith.constant 0 : index
    %c0_9 = arith.constant 0 : index
    %22 = vector.load %arg10[%c0_8, %c0_9] : memref<32x256xf32, #tpu.memory_space<vmem>>, vector<32x256xf32>
    %cst_10 = arith.constant dense<0.000000e+00> : vector<32x256xf32>
    %23 = tpu.matmul %22, %18, %cst_10 {dimension_numbers = #tpu.dot_dimension_numbers<[1], [1], [0], [0], [0, 0, 1, 0], [], []>} : vector<32x256xf32>, vector<256x256xf32>, vector<32x256xf32> -> vector<32x256xf32>
    %c0_11 = arith.constant 0 : index
    %24 = memref.load %arg5[%c0_11] : memref<1xf32, #tpu.memory_space<smem>>
    %c0_12 = arith.constant 0 : index
    %c0_13 = arith.constant 0 : index
    %25 = arith.index_cast %4 : i32 to index
    %26 = vector.load %arg2[%c0_12, %c0_13, %25] : memref<1x32x256xf32, #tpu.memory_space<vmem>>, vector<1x32x256xf32>
    %27 = vector.shape_cast %26 : vector<1x32x256xf32> to vector<32x256xf32>
    %28 = vector.broadcast %24 : f32 to vector<32x256xf32>
    %29 = arith.mulf %28, %23 : vector<32x256xf32>
    %30 = arith.addf %27, %29 : vector<32x256xf32>
    %c0_14 = arith.constant 0 : index
    %c0_15 = arith.constant 0 : index
    %c0_16 = arith.constant 0 : index
    %31 = vector.load %arg6[%c0_14, %c0_15, %c0_16] : memref<1x32x256xf32, #tpu.memory_space<vmem>>, vector<1x32x256xf32>
    %32 = vector.shape_cast %31 : vector<1x32x256xf32> to vector<32x256xf32>
    %33 = vector.shape_cast %30 : vector<32x256xf32> to vector<1x32x256xf32>
    tpu.vector_store %arg6[%c0_14, %c0_15, %c0_16], %33 {strides = array<i32>} : memref<1x32x256xf32, #tpu.memory_space<vmem>>, vector<1x32x256xf32>,
    return
  }
  func.func @transform_0(%arg0: i32, %arg1: i32) -> (i32, i32, i32) {
    %c0_i32 = arith.constant 0 : i32
    %c0_i32_0 = arith.constant 0 : i32
    %c0_i32_1 = arith.constant 0 : i32
    return %arg0, %c0_i32, %c0_i32_0 : i32, i32, i32
  }
  func.func @transform_1(%arg0: i32, %arg1: i32) -> (i32, i32) {
    %c0_i32 = arith.constant 0 : i32
    %c0_i32_0 = arith.constant 0 : i32
    %c0_i32_1 = arith.constant 0 : i32
    return %c0_i32, %c0_i32_0 : i32, i32
  }
  func.func @transform_2(%arg0: i32, %arg1: i32) -> (i32, i32) {
    %c0_i32 = arith.constant 0 : i32
    %c0_i32_0 = arith.constant 0 : i32
    %c0_i32_1 = arith.constant 0 : i32
    return %c0_i32, %c0_i32_0 : i32, i32
  }
  func.func @transform_3(%arg0: i32, %arg1: i32) -> i32 {
    %c0_i32 = arith.constant 0 : i32
    %c0_i32_0 = arith.constant 0 : i32
    return %c0_i32 : i32
  }
  func.func @transform_4(%arg0: i32, %arg1: i32) -> (i32, i32, i32) {
    %c0_i32 = arith.constant 0 : i32
    %c0_i32_0 = arith.constant 0 : i32
    return %arg0, %c0_i32, %arg1 : i32, i32, i32
  }
  func.func @transform_5(%arg0: i32, %arg1: i32) -> (i32, i32, i32) {
    %c0_i32 = arith.constant 0 : i32
    %c0_i32_0 = arith.constant 0 : i32
    return %arg0, %arg1, %c0_i32 : i32, i32, i32
  }
}

</mosaic_0001>

<bundles_post_ra>
// kernel: tpu_custom_call.1
= control target key start
LH: loop header
LB: loop body
LE: loop exit
PB: predicated region body
PF: predicated region fallthrough
CT: control target
= control target key end

     0   :  { %s3250_s0 = inlined_call_operand.vmem [shape: f32[2,32,256], index: 0, kind: input, shape index: {}]   ;;  %s3251_s1 = inlined_call_operand.vmem [shape: f32[48,32], index: 1, kind: input, shape index: {}]   ;;  %s3252_s2 = inlined_call_operand.vmem [shape: f32[48,1], index: 2, kind: input, shape index: {}]   ;;  %s3253_s3 = inlined_call_operand.<no memory space> [shape: f32[1], index: 3, kind: input, shape index: {}]   ;;  %s3254_s4 = inlined_call_operand.hbm [shape: f32[2,32,256], index: 4, kind: output, shape index: {0}]   ;;  %s3255_s5 = inlined_call_operand.hbm [shape: f32[2,256,256], index: 5, kind: output, shape index: {1}]  }
   0x1   :  { %11 = sst [smem:[#allocation5]] %s3253_s3 }
   0x2   :  { %12 = vsyncpa [#allocation7], 0 }
   0x3   :  { %14 = vsyncpa [#allocation7 + $0x1], 0 }
   0x4   :  { %15 = vsyncpa [#allocation9], 0 }
   0x5   :  { %17 = vsyncpa [#allocation9 + $0x1], 0  ;;  %s2282_s20 = smov 0   ;;  %s2284_s21 = smov 0  }
   0x6   :  { %s2286_s22 = smov 0   ;;  %s2288_s23 = smov 0  }
   0x7   :  { %s2290_s24 = smov 0   ;;  %s2292_s25 = smov 0  }
   0x8 LB: > { %s1755_s3 = sadd.s32 4294967295, %s2241_s25   ;;  %s1756_s26 = sadd.s32 4294967294, %s2241_s25   ;;  %s2241_s25 = sphi %s2292_s25, %s23_s25   ;;  %s2237_s24 = sphi %s2290_s24, %s3353_s24   ;;  %s2233_s23 = sphi %s2288_s23, %s3352_s23   ;;  %s2229_s22 = sphi %s2286_s22, %s3351_s22   ;;  %s2225_s21 = sphi %s2284_s21, %s3350_s21   ;;  %s2221_s20 = sphi %s2282_s20, %s3349_s20  }
   0x9   : > { %s35_s27 = sadd.s32 1, %s2237_s24  ;;  %s133_s28 = sadd.s32 1, %s2229_s22 }
   0xa   : > { %p37_p0 = scmp.ge.s32.totalorder %s35_s27, 2  ;;  %p143_p1 = scmp.ne.s32.totalorder %s2229_s22, %s2225_s21 }
   0xb   : > { %p144_p2 = scmp.eq.s32.totalorder %s1755_s3, 1  ;;  %p149_p3 = scmp.ne.s32.totalorder %s2225_s21, %s2221_s20 }
   0xc   : > { %s3355_s27 = smov (%p37_p0, %s35_s27), 0  ;;  %p150_p5 = scmp.eq.s32.totalorder %s1756_s26, 1 }
   0xd   : > { %p2322_p4 = por %p144_p2, %p143_p1  ;;  %s128_s30 = ssub.s32 %s2237_s24, %s3355_s27 }
   0xe   : > { %p1759_p6 = scmp.ge.s32.totalorder %s2241_s25, 1  ;;  %p131_p7 = scmp.eq.s32.totalorder %s128_s30, 0 }
   0xf   : > { %p2329_p8 = por %p150_p5, %p149_p3  ;;  %p213_p9 = scmp.lt.s32.totalorder %s2241_s25, 3 }
  0x10   : > { %s2335_s7 = scalar_select %p131_p7, %s2229_s22, %s133_s28  }
  0x11   : > { %p214_p10 = pnand %p1759_p6, %p213_p9 }
  0x13   : > { %217 = sbr.rel (%p214_p10) target bundleno = 1373 (0x55d), region = 36 }
  0x18   : > { %p246_p11 = scmp.lt.s32.totalorder %s2233_s23, 1  ;;  %v2243_v0 = vmov 0.0   ;;  %v2244_v1 = vmov 0   ;;  %v276_v2 = vld [vmem:[%s3252_s2 + $0x28] sm:$0xff]  ;;  %v275_v3 = vld [vmem:[%s3252_s2 + $0x20] sm:$0xff]  ;;  %vm307_vm0 = vcmask 261120  }
  0x19   : > { %390 = vmatprep.mubr.f32.mxu0 %v2243_v0  ;;  %731 = vmatprep.mubr.f32.mxu1 %v2243_v0  ;;  %v265_v12 = vld [vmem:[%s3251_s1] sm:$0xff]  ;;  %v266_v13 = vld [vmem:[%s3251_s1 + $0x8] sm:$0xff]  ;;  %v267_v14 = vld [vmem:[%s3251_s1 + $0x10] sm:$0xff]  ;;  %vm501_vm1 = vcmask 64512   ;;  %s2907_s13 = sand.u32 1, %s2225_s21   ;;  %s1812_s9 = sshll.u32 %s2233_s23, 13 }
  0x1a   : > { %s247_s8 = scalar_select %p246_p11, %s2233_s23, 1  ;;  %1941 = vset.pattern.permute.xlu0 %v2244_v1  ;;  %v268_v15 = vld [vmem:[%s3251_s1 + $0x18] sm:$0xff]  ;;  %v269_v16 = vld [vmem:[%s3251_s1 + $0x20] sm:$0xff]  ;;  %v270_v17 = vld [vmem:[%s3251_s1 + $0x28] sm:$0xff] }
  0x1b   : > { %304 = vperm.xlu0 %1941, %v276_v2   ;;  %s1761_s14 = sshll.u32 %s2907_s13, 9  ;;  %s1609_s17 = scalar_lea.sflag [#allocation9], %s2907_s13 }
  0x1c   : > { %s1810_s11 = sshll.u32 %s247_s8, 6  ;;  %s2922_s15 = scalar_lea.vmem [#allocation8], %s1761_s14 }
  0x1d   : > { %s2351_s16 = scalar_lea.vmem %s3250_s0, %s1810_s11  ;;  %s1643_s10 = sshll.u32 %s2922_s15, 4  ;;  %s3159_s10 = int_to_ptr.vmem [resolvable:$true] %s1643_s10 }
  0x1e   : > { %v264_v4 = vld [vmem:[%s2351_s16 + $0x38] sm:$0xff]  ;;  %v263_v5 = vld [vmem:[%s2351_s16 + $0x30] sm:$0xff]  ;;  %v262_v6 = vld [vmem:[%s2351_s16 + $0x28] sm:$0xff]  ;;  %s3157_s14 = scalar_lea.hbm %s3255_s5, %s1812_s9  ;;  %s2135_s18 = scalar_lea.vmem %s3159_s10, 8192 }
  0x1f   : > { %350 = vmatprep.subr.mxu0 %v264_v4  ;;  %v261_v7 = vld [vmem:[%s2351_s16 + $0x20] sm:$0xff]  ;;  %299 = vperm.xlu0 %1941, %v275_v3   ;;  %v260_v8 = vld [vmem:[%s2351_s16 + $0x18] sm:$0xff]  ;;  %v259_v9 = vld [vmem:[%s2351_s16 + $0x10] sm:$0xff]  ;;  %p2136_p12 = scmp.ne.s32.totalorder %s3159_s10, %s2135_s18  ;;  %s2245_s19 = smov [#allocation8]  }
  0x20   : > { %351 = vmatpush1.msra.mxu0 %v263_v5  ;;  %v258_v10 = vld [vmem:[%s2351_s16 + $0x8] sm:$0xff]  ;;  %v257_v11 = vld [vmem:[%s2351_s16] sm:$0xff]  ;;  %s2139_s3 = sshll.u32 %s2245_s19, 4  ;;  %s2140_s3 = int_to_ptr.vmem [resolvable:$false] %s2139_s3 }
  0x21   : > { %352 = vmatprep.subr.mxu0 %v262_v6  ;;  %p2137_p13 = pnand %p2136_p12, %p2322_p4  ;;  %p2142_p1 = scmp.lt.s32.totalorder %s3159_s10, %s2140_s3 }
  0x22   : > { %353 = vmatpush1.msra.mxu0 %v261_v7 }
  0x23   : > { %354 = vmatprep.subr.mxu0 %v260_v8  ;;  %p2138_p0 = pneg %p2137_p13 }
  0x24   : > { %355 = vmatpush1.msra.mxu0 %v259_v9 }
  0x25   : > { %356 = vmatprep.subr.mxu0 %v258_v10 }
  0x26   : > { %357 = vmatpush1.msra.mxu0 %v257_v11 }
  0x27   : > { %1764 = vmatmul.mubr.msk.f32.vlgmr.msra.gmra.mxu0 %vm307_vm0, %v265_v12 }
  0x28   : > { %396 = vmatprep.mubr.f32.mxu0 %v2243_v0 }
  0x2b   : > { %1765 = vmatmul.mubr.msk.f32.gmra.mxu0 %vm307_vm0, %v266_v13 }
  0x2c   : > { %402 = vmatprep.mubr.f32.mxu0 %v2243_v0 }
  0x2f   : > { %1766 = vmatmul.mubr.msk.f32.gmra.mxu0 %vm307_vm0, %v267_v14 }
  0x30   : > { %408 = vmatprep.mubr.f32.mxu0 %v2243_v0 }
  0x33   : > { %1767 = vmatmul.mubr.msk.f32.gmra.mxu0 %vm307_vm0, %v268_v15 }
  0x34   : > { %414 = vmatprep.mubr.f32.mxu0 %v2243_v0 }
  0x37   : > { %1768 = vmatmul.mubr.msk.f32.gmra.mxu0 %vm307_vm0, %v269_v16 }
  0x38   : > { %420 = vmatprep.mubr.f32.mxu0 %v2243_v0 }
  0x3b   : > { %1769 = vmatmul.mubr.msk.f32.gmra.mxu0 %vm307_vm0, %v270_v17 }
  0x96   : > { %v305_v24 = vpop.permute.xlu0 %304 }
  0x9a   : > { %v300_v28 = vpop.permute.xlu0 %299 }
  0xe7   : > { %v2390_v18 = vpop.f32.mrf.mxu0 }
  0xe8   : > { %3283 = vst [vmem:[#allocation12_spill] sm:$0xff] %v2390_v18 }
  0xe9   : > { %v2392_v19 = vpop.f32.mrf.mxu0 }
  0xea   : > { %3284 = vst [vmem:[#allocation13_spill] sm:$0xff] %v2392_v19 }
  0xeb   : > { %v2394_v20 = vpop.f32.mrf.mxu0 }
  0xec   : > { %3285 = vst [vmem:[#allocation14_spill] sm:$0xff] %v2394_v20 }
  0xed   : > { %v2396_v21 = vpop.f32.mrf.mxu0 }
  0xee   : > { %3286 = vst [vmem:[#allocation15_spill] sm:$0xff] %v2396_v21 }
  0xef   : > { %v2398_v22 = vpop.f32.mrf.mxu0 }
  0xf0   : > { %3287 = vst [vmem:[#allocation16_spill] sm:$0xff] %v2398_v22 }
  0xf1   : > { %v2400_v23 = vpop.f32.mrf.mxu0 }
  0xf2   : > { %3288 = vst [vmem:[#allocation17_spill] sm:$0xff] %v2400_v23 }
  0xf3   : > { %v2402_v25 = vpop.f32.mrf.mxu0 }
  0xf4   : > { %3289 = vst [vmem:[#allocation18_spill] sm:$0xff] %v2402_v25 }
  0xf5   : > { %v2404_v26 = vpop.f32.mrf.mxu0 }
  0xf6   : > { %3290 = vst [vmem:[#allocation19_spill] sm:$0xff] %v2404_v26 }
  0xf7   : > { %v416_v27 = vpop.f32.mrf.mxu0 }
  0xf8   : > { %v417_v31 = vadd.f32 %v416_v27, %v300_v28 }
  0xf9   : > { %v418_v29 = vpop.f32.mrf.mxu0 }
  0xfa   : > { %v419_v30 = vadd.f32 %v418_v29, %v300_v28 }
  0xfb   : > { %v422_v32 = vpop.f32.mrf.mxu0 }
  0xfc   : > { %697 = vmatprep.subr.mxu1 %v419_v30  ;;  %v423_v33 = vadd.f32 %v422_v32, %v305_v24 }
  0xfd   : > { %698 = vmatpush1.msra.mxu1 %v417_v31  ;;  %v424_v34 = vpop.f32.mrf.mxu0 }
  0xfe   : > { %437 = vxpose.xlu1.b32.start.end [1/1] (short) %v423_v33, 128  ;;  %v425_v35 = vadd.f32 %v424_v34, %v305_v24 }
 0x13b   : > { %469 = vxpose.xlu1.b32.start.end [1/1] (short) %v425_v35, 128 }
 0x159   : > { %1942 = vset.pattern.permute.xlu1 %v2244_v1 }
 0x17a   : > { %v453_v36 = vpop.trf.xlu1 }
 0x17b   : > { %502 = vst.msk [vmem:[#allocation3] sm:$0xff] %vm501_vm1, %v453_v36 }
 0x17e   : > { %v454_v37 = vpop.trf.xlu1 }
 0x17f   : > { %503 = vst.msk [vmem:[#allocation3 + $0x8] sm:$0xff] %vm501_vm1, %v454_v37 }
 0x182   : > { %v455_v38 = vpop.trf.xlu1  ;;  %v536_v39 = vld [vmem:[#allocation3] sm:$0xff] }
 0x183   : > { %504 = vst.msk [vmem:[#allocation3 + $0x10] sm:$0xff] %vm501_vm1, %v455_v38  ;;  %1770 = vmatmul.mubr.msk.f32.vlgmr.msra.gmra.mxu1 %vm501_vm1, %v536_v39 }
 0x184   : > { %737 = vmatprep.mubr.f32.mxu1 %v2243_v0 }
 0x186   : > { %v456_v40 = vpop.trf.xlu1  ;;  %v537_v41 = vld [vmem:[#allocation3 + $0x8] sm:$0xff] }
 0x187   : > { %505 = vst.msk [vmem:[#allocation3 + $0x18] sm:$0xff] %vm501_vm1, %v456_v40  ;;  %1771 = vmatmul.mubr.msk.f32.gmra.mxu1 %vm501_vm1, %v537_v41 }
 0x188   : > { %743 = vmatprep.mubr.f32.mxu1 %v2243_v0 }
 0x18a   : > { %v457_v42 = vpop.trf.xlu1  ;;  %v538_v43 = vld [vmem:[#allocation3 + $0x10] sm:$0xff] }
 0x18b   : > { %506 = vst.msk [vmem:[#allocation3 + $0x20] sm:$0xff] %vm501_vm1, %v457_v42  ;;  %1772 = vmatmul.mubr.msk.f32.gmra.mxu1 %vm501_vm1, %v538_v43 }
 0x18c   : > { %749 = vmatprep.mubr.f32.mxu1 %v2243_v0 }
 0x18e   : > { %v458_v44 = vpop.trf.xlu1  ;;  %v539_v45 = vld [vmem:[#allocation3 + $0x18] sm:$0xff] }
 0x18f   : > { %507 = vst.msk [vmem:[#allocation3 + $0x28] sm:$0xff] %vm501_vm1, %v458_v44  ;;  %1773 = vmatmul.mubr.msk.f32.gmra.mxu1 %vm501_vm1, %v539_v45 }
 0x190   : > { %755 = vmatprep.mubr.f32.mxu1 %v2243_v0 }
 0x192   : > { %v459_v46 = vpop.trf.xlu1  ;;  %v540_v47 = vld [vmem:[#allocation3 + $0x20] sm:$0xff] }
 0x193   : > { %508 = vst.msk [vmem:[#allocation3 + $0x30] sm:$0xff] %vm501_vm1, %v459_v46  ;;  %1774 = vmatmul.mubr.msk.f32.gmra.mxu1 %vm501_vm1, %v540_v47 }
 0x194   : > { %761 = vmatprep.mubr.f32.mxu1 %v2243_v0 }
 0x196   : > { %v460_v48 = vpop.trf.xlu1  ;;  %v541_v49 = vld [vmem:[#allocation3 + $0x28] sm:$0xff] }
 0x197   : > { %509 = vst.msk [vmem:[#allocation3 + $0x38] sm:$0xff] %vm501_vm1, %v460_v48  ;;  %1775 = vmatmul.mubr.msk.f32.gmra.mxu1 %vm501_vm1, %v541_v49 }
 0x198   : > { %767 = vmatprep.mubr.f32.mxu1 %v2243_v0 }
 0x19a   : > { %v461_v50 = vpop.trf.xlu1  ;;  %v542_v51 = vld [vmem:[#allocation3 + $0x30] sm:$0xff] }
 0x19b   : > { %510 = vst.msk [vmem:[#allocation3 + $0x40] sm:$0xff] %vm501_vm1, %v461_v50  ;;  %1776 = vmatmul.mubr.msk.f32.gmra.mxu1 %vm501_vm1, %v542_v51 }
 0x19c   : > { %773 = vmatprep.mubr.f32.mxu1 %v2243_v0 }
 0x19e   : > { %v462_v52 = vpop.trf.xlu1  ;;  %v543_v53 = vld [vmem:[#allocation3 + $0x38] sm:$0xff] }
 0x19f   : > { %511 = vst.msk [vmem:[#allocation3 + $0x48] sm:$0xff] %vm501_vm1, %v462_v52  ;;  %1777 = vmatmul.mubr.msk.f32.gmra.mxu1 %vm501_vm1, %v543_v53 }
 0x1a0   : > { %779 = vmatprep.mubr.f32.mxu1 %v2243_v0 }
 0x1a2   : > { %v463_v54 = vpop.trf.xlu1  ;;  %v544_v55 = vld [vmem:[#allocation3 + $0x40] sm:$0xff] }
 0x1a3   : > { %512 = vst.msk [vmem:[#allocation3 + $0x50] sm:$0xff] %vm501_vm1, %v463_v54  ;;  %1778 = vmatmul.mubr.msk.f32.gmra.mxu1 %vm501_vm1, %v544_v55 }
 0x1a4   : > { %785 = vmatprep.mubr.f32.mxu1 %v2243_v0 }
 0x1a6   : > { %v464_v56 = vpop.trf.xlu1  ;;  %v545_v57 = vld [vmem:[#allocation3 + $0x48] sm:$0xff] }
 0x1a7   : > { %513 = vst.msk [vmem:[#allocation3 + $0x58] sm:$0xff] %vm501_vm1, %v464_v56  ;;  %1779 = vmatmul.mubr.msk.f32.gmra.mxu1 %vm501_vm1, %v545_v57 }
 0x1a8   : > { %791 = vmatprep.mubr.f32.mxu1 %v2243_v0 }
 0x1aa   : > { %v465_v58 = vpop.trf.xlu1  ;;  %v546_v59 = vld [vmem:[#allocation3 + $0x50] sm:$0xff] }
 0x1ab   : > { %514 = vst.msk [vmem:[#allocation3 + $0x60] sm:$0xff] %vm501_vm1, %v465_v58  ;;  %1780 = vmatmul.mubr.msk.f32.gmra.mxu1 %vm501_vm1, %v546_v59 }
 0x1ac   : > { %797 = vmatprep.mubr.f32.mxu1 %v2243_v0 }
 0x1ae   : > { %v466_v60 = vpop.trf.xlu1  ;;  %v547_v61 = vld [vmem:[#allocation3 + $0x58] sm:$0xff] }
 0x1af   : > { %515 = vst.msk [vmem:[#allocation3 + $0x68] sm:$0xff] %vm501_vm1, %v466_v60  ;;  %1781 = vmatmul.mubr.msk.f32.gmra.mxu1 %vm501_vm1, %v547_v61 }
 0x1b0   : > { %803 = vmatprep.mubr.f32.mxu1 %v2243_v0 }
 0x1b2   : > { %v467_v62 = vpop.trf.xlu1  ;;  %v548_v63 = vld [vmem:[#allocation3 + $0x60] sm:$0xff] }
 0x1b3   : > { %516 = vst.msk [vmem:[#allocation3 + $0x70] sm:$0xff] %vm501_vm1, %v467_v62  ;;  %1782 = vmatmul.mubr.msk.f32.gmra.mxu1 %vm501_vm1, %v548_v63 }
 0x1b4   : > { %809 = vmatprep.mubr.f32.mxu1 %v2243_v0 }
 0x1b6   : > { %v468_v1 = vpop.trf.xlu1  ;;  %v549_v2 = vld [vmem:[#allocation3 + $0x68] sm:$0xff] }
 0x1b7   : > { %517 = vst.msk [vmem:[#allocation3 + $0x78] sm:$0xff] %vm501_vm1, %v468_v1  ;;  %1783 = vmatmul.mubr.msk.f32.gmra.mxu1 %vm501_vm1, %v549_v2 }
 0x1b8   : > { %815 = vmatprep.mubr.f32.mxu1 %v2243_v0 }
 0x1ba   : > { %v485_v3 = vpop.trf.xlu1  ;;  %v550_v4 = vld [vmem:[#allocation3 + $0x70] sm:$0xff] }
 0x1bb   : > { %518 = vst.msk [vmem:[#allocation3 + $0x80] sm:$0xff] %vm501_vm1, %v485_v3  ;;  %1784 = vmatmul.mubr.msk.f32.gmra.mxu1 %vm501_vm1, %v550_v4 }
 0x1bc   : > { %821 = vmatprep.mubr.f32.mxu1 %v2243_v0 }
 0x1be   : > { %v486_v5 = vpop.trf.xlu1  ;;  %v551_v6 = vld [vmem:[#allocation3 + $0x78] sm:$0xff] }
 0x1bf   : > { %519 = vst.msk [vmem:[#allocation3 + $0x88] sm:$0xff] %vm501_vm1, %v486_v5  ;;  %1785 = vmatmul.mubr.msk.f32.gmra.mxu1 %vm501_vm1, %v551_v6 }
 0x1c0   : > { %827 = vmatprep.mubr.f32.mxu1 %v2243_v0 }
 0x1c2   : > { %v487_v7 = vpop.trf.xlu1  ;;  %v552_v8 = vld [vmem:[#allocation3 + $0x80] sm:$0xff] }
 0x1c3   : > { %520 = vst.msk [vmem:[#allocation3 + $0x90] sm:$0xff] %vm501_vm1, %v487_v7  ;;  %1786 = vmatmul.mubr.msk.f32.gmra.mxu1 %vm501_vm1, %v552_v8 }
 0x1c4   : > { %833 = vmatprep.mubr.f32.mxu1 %v2243_v0 }
 0x1c6   : > { %v488_v9 = vpop.trf.xlu1  ;;  %v553_v10 = vld [vmem:[#allocation3 + $0x88] sm:$0xff] }
 0x1c7   : > { %521 = vst.msk [vmem:[#allocation3 + $0x98] sm:$0xff] %vm501_vm1, %v488_v9  ;;  %1787 = vmatmul.mubr.msk.f32.gmra.mxu1 %vm501_vm1, %v553_v10 }
 0x1c8   : > { %839 = vmatprep.mubr.f32.mxu1 %v2243_v0 }
 0x1ca   : > { %v489_v11 = vpop.trf.xlu1  ;;  %v554_v12 = vld [vmem:[#allocation3 + $0x90] sm:$0xff] }
 0x1cb   : > { %522 = vst.msk [vmem:[#allocation3 + $0xa0] sm:$0xff] %vm501_vm1, %v489_v11  ;;  %1788 = vmatmul.mubr.msk.f32.gmra.mxu1 %vm501_vm1, %v554_v12 }
 0x1cc   : > { %845 = vmatprep.mubr.f32.mxu1 %v2243_v0 }
 0x1ce   : > { %v490_v13 = vpop.trf.xlu1  ;;  %v555_v14 = vld [vmem:[#allocation3 + $0x98] sm:$0xff] }
 0x1cf   : > { %523 = vst.msk [vmem:[#allocation3 + $0xa8] sm:$0xff] %vm501_vm1, %v490_v13  ;;  %1789 = vmatmul.mubr.msk.f32.gmra.mxu1 %vm501_vm1, %v555_v14 }
 0x1d0   : > { %851 = vmatprep.mubr.f32.mxu1 %v2243_v0 }
 0x1d2   : > { %v491_v15 = vpop.trf.xlu1  ;;  %v556_v16 = vld [vmem:[#allocation3 + $0xa0] sm:$0xff] }
 0x1d3   : > { %524 = vst.msk [vmem:[#allocation3 + $0xb0] sm:$0xff] %vm501_vm1, %v491_v15  ;;  %1790 = vmatmul.mubr.msk.f32.gmra.mxu1 %vm501_vm1, %v556_v16 }
 0x1d4   : > { %857 = vmatprep.mubr.f32.mxu1 %v2243_v0 }
 0x1d6   : > { %v492_v17 = vpop.trf.xlu1  ;;  %v557_v24 = vld [vmem:[#allocation3 + $0xa8] sm:$0xff] }
 0x1d7   : > { %525 = vst.msk [vmem:[#allocation3 + $0xb8] sm:$0xff] %vm501_vm1, %v492_v17  ;;  %1791 = vmatmul.mubr.msk.f32.gmra.mxu1 %vm501_vm1, %v557_v24 }
 0x1d8   : > { %863 = vmatprep.mubr.f32.mxu1 %v2243_v0 }
 0x1da   : > { %v493_v27 = vpop.trf.xlu1  ;;  %v558_v28 = vld [vmem:[#allocation3 + $0xb0] sm:$0xff] }
 0x1db   : > { %526 = vst.msk [vmem:[#allocation3 + $0xc0] sm:$0xff] %vm501_vm1, %v493_v27  ;;  %1792 = vmatmul.mubr.msk.f32.gmra.mxu1 %vm501_vm1, %v558_v28 }
 0x1dc   : > { %869 = vmatprep.mubr.f32.mxu1 %v2243_v0 }
 0x1de   : > { %v494_v29 = vpop.trf.xlu1  ;;  %v559_v30 = vld [vmem:[#allocation3 + $0xb8] sm:$0xff] }
 0x1df   : > { %527 = vst.msk [vmem:[#allocation3 + $0xc8] sm:$0xff] %vm501_vm1, %v494_v29  ;;  %1793 = vmatmul.mubr.msk.f32.gmra.mxu1 %vm501_vm1, %v559_v30 }
 0x1e0   : > { %875 = vmatprep.mubr.f32.mxu1 %v2243_v0 }
 0x1e2   : > { %v495_v31 = vpop.trf.xlu1  ;;  %v560_v32 = vld [vmem:[#allocation3 + $0xc0] sm:$0xff] }
 0x1e3   : > { %528 = vst.msk [vmem:[#allocation3 + $0xd0] sm:$0xff] %vm501_vm1, %v495_v31  ;;  %1794 = vmatmul.mubr.msk.f32.gmra.mxu1 %vm501_vm1, %v560_v32 }
 0x1e4   : > { %881 = vmatprep.mubr.f32.mxu1 %v2243_v0 }
 0x1e6   : > { %v496_v33 = vpop.trf.xlu1  ;;  %v561_v34 = vld [vmem:[#allocation3 + $0xc8] sm:$0xff] }
 0x1e7   : > { %529 = vst.msk [vmem:[#allocation3 + $0xd8] sm:$0xff] %vm501_vm1, %v496_v33  ;;  %1795 = vmatmul.mubr.msk.f32.gmra.mxu1 %vm501_vm1, %v561_v34 }
 0x1e8   : > { %887 = vmatprep.mubr.f32.mxu1 %v2243_v0 }
 0x1ea   : > { %v497_v35 = vpop.trf.xlu1  ;;  %v562_v36 = vld [vmem:[#allocation3 + $0xd0] sm:$0xff] }
 0x1eb   : > { %530 = vst.msk [vmem:[#allocation3 + $0xe0] sm:$0xff] %vm501_vm1, %v497_v35  ;;  %1796 = vmatmul.mubr.msk.f32.gmra.mxu1 %vm501_vm1, %v562_v36 }
 0x1ec   : > { %893 = vmatprep.mubr.f32.mxu1 %v2243_v0 }
 0x1ee   : > { %v498_v37 = vpop.trf.xlu1  ;;  %v563_v38 = vld [vmem:[#allocation3 + $0xd8] sm:$0xff] }
 0x1ef   : > { %531 = vst.msk [vmem:[#allocation3 + $0xe8] sm:$0xff] %vm501_vm1, %v498_v37  ;;  %1797 = vmatmul.mubr.msk.f32.gmra.mxu1 %vm501_vm1, %v563_v38 }
 0x1f0   : > { %899 = vmatprep.mubr.f32.mxu1 %v2243_v0 }
 0x1f2   : > { %v499_v39 = vpop.trf.xlu1  ;;  %v564_v40 = vld [vmem:[#allocation3 + $0xe0] sm:$0xff] }
 0x1f3   : > { %532 = vst.msk [vmem:[#allocation3 + $0xf0] sm:$0xff] %vm501_vm1, %v499_v39  ;;  %1798 = vmatmul.mubr.msk.f32.gmra.mxu1 %vm501_vm1, %v564_v40 }
 0x1f4   : > { %905 = vmatprep.mubr.f32.mxu1 %v2243_v0 }
 0x1f6   : > { %v500_v41 = vpop.trf.xlu1  ;;  %v565_v42 = vld [vmem:[#allocation3 + $0xe8] sm:$0xff] }
 0x1f7   : > { %533 = vst.msk [vmem:[#allocation3 + $0xf8] sm:$0xff] %vm501_vm1, %v500_v41  ;;  %1799 = vmatmul.mubr.msk.f32.gmra.mxu1 %vm501_vm1, %v565_v42 }
 0x1f8   : > { %911 = vmatprep.mubr.f32.mxu1 %v2243_v0 }
 0x1fa   : > { %v566_v43 = vld [vmem:[#allocation3 + $0xf0] sm:$0xff] }
 0x1fb   : > { %1800 = vmatmul.mubr.msk.f32.gmra.mxu1 %vm501_vm1, %v566_v43 }
 0x1fc   : > { %917 = vmatprep.mubr.f32.mxu1 %v2243_v0 }
 0x1fe   : > { %v567_v44 = vld [vmem:[#allocation3 + $0xf8] sm:$0xff] }
 0x1ff   : > { %1801 = vmatmul.mubr.msk.f32.gmra.mxu1 %vm501_vm1, %v567_v44 }
 0x243   : > { %v2502_v45 = vpop.f32.mrf.mxu1 }
 0x245   : > { %v2504_v46 = vpop.f32.mrf.mxu1 }
 0x247   : > { %v2506_v47 = vpop.f32.mrf.mxu1 }
 0x249   : > { %v2508_v48 = vpop.f32.mrf.mxu1 }
 0x24b   : > { %v2510_v49 = vpop.f32.mrf.mxu1 }
 0x24d   : > { %v2512_v50 = vpop.f32.mrf.mxu1 }
 0x24f   : > { %v2514_v51 = vpop.f32.mrf.mxu1 }
 0x251   : > { %v2516_v52 = vpop.f32.mrf.mxu1 }
 0x253   : > { %v2518_v0 = vpop.f32.mrf.mxu1 }
 0x255   : > { %v2520_v53 = vpop.f32.mrf.mxu1 }
 0x257   : > { %v2522_v54 = vpop.f32.mrf.mxu1 }
 0x259   : > { %v2524_v55 = vpop.f32.mrf.mxu1 }
 0x25a   : > { %v939_v43 = vmax.f32 %v2522_v54, %v2524_v55 }
 0x25b   : > { %v2526_v56 = vpop.f32.mrf.mxu1 }
 0x25d   : > { %v2528_v57 = vpop.f32.mrf.mxu1 }
 0x25e   : > { %v942_v38 = vmax.f32 %v2526_v56, %v2528_v57 }
 0x25f   : > { %v2530_v58 = vpop.f32.mrf.mxu1 }
 0x261   : > { %v2532_v59 = vpop.f32.mrf.mxu1 }
 0x262   : > { %v945_v60 = vmax.f32 %v2530_v58, %v2532_v59 }
 0x263   : > { %v2536_v61 = vpop.f32.mrf.mxu1 }
 0x264   : > { %946 = vmax.xlane.f32.xlu1 %v945_v60 }
 0x265   : > { %v2538_v62 = vpop.f32.mrf.mxu1 }
 0x266   : > { %v948_v35 = vmax.f32 %v2536_v61, %v2538_v62 }
 0x267   : > { %v2540_v63 = vpop.f32.mrf.mxu1 }
 0x269   : > { %v2542_v1 = vpop.f32.mrf.mxu1 }
 0x26a   : > { %v951_v32 = vmax.f32 %v2540_v63, %v2542_v1 }
 0x26b   : > { %v2544_v2 = vpop.f32.mrf.mxu1 }
 0x26d   : > { %v2546_v3 = vpop.f32.mrf.mxu1 }
 0x26e   : > { %v954_v29 = vmax.f32 %v2544_v2, %v2546_v3 }
 0x26f   : > { %v2548_v4 = vpop.f32.mrf.mxu1 }
 0x271   : > { %v2550_v5 = vpop.f32.mrf.mxu1 }
 0x272   : > { %v957_v6 = vmax.f32 %v2548_v4, %v2550_v5 }
 0x273   : > { %v2554_v7 = vpop.f32.mrf.mxu1 }
 0x274   : > { %958 = vmax.xlane.f32.xlu0 %v957_v6 }
 0x275   : > { %v2556_v8 = vpop.f32.mrf.mxu1 }
 0x276   : > { %v960_v9 = vmax.f32 %v2554_v7, %v2556_v8 }
 0x277   : > { %v2560_v10 = vpop.f32.mrf.mxu1 }
 0x278   : > { %961 = vmax.xlane.f32.xlu0 %v960_v9  ;;  %v936_v9 = vmax.f32 %v2518_v0, %v2520_v53 }
 0x279   : > { %v2562_v11 = vpop.f32.mrf.mxu1 }
 0x27a   : > { %v963_v12 = vmax.f32 %v2560_v10, %v2562_v11 }
 0x27b   : > { %v2566_v13 = vpop.f32.mrf.mxu1 }
 0x27c   : > { %964 = vmax.xlane.f32.xlu0 %v963_v12 }
 0x27d   : > { %v2568_v14 = vpop.f32.mrf.mxu1 }
 0x27e   : > { %v966_v15 = vmax.f32 %v2566_v13, %v2568_v14 }
 0x27f   : > { %v2572_v16 = vpop.f32.mrf.mxu1 }
 0x280   : > { %967 = vmax.xlane.f32.xlu0 %v966_v15 }
 0x281   : > { %v2574_v17 = vpop.f32.mrf.mxu1 }
 0x282   : > { %v969_v24 = vmax.f32 %v2572_v16, %v2574_v17 }
 0x283   : > { %v2578_v27 = vpop.f32.mrf.mxu1 }
 0x284   : > { %3291 = vst [vmem:[#allocation20_spill] sm:$0xff] %v2578_v27  ;;  %970 = vmax.xlane.f32.xlu0 %v969_v24 }
 0x285   : > { %v2580_v28 = vpop.f32.mrf.mxu1 }
 0x286   : > { %3292 = vst [vmem:[#allocation21_spill] sm:$0xff] %v2580_v28  ;;  %v972_v15 = vmax.f32 %v2578_v27, %v2580_v28 }
 0x287   : > { %v2584_v30 = vpop.f32.mrf.mxu1 }
 0x288   : > { %3293 = vst [vmem:[#allocation22_spill] sm:$0xff] %v2584_v30  ;;  %955 = vmax.xlane.f32.xlu0 %v954_v29  ;;  %v933_v29 = vmax.f32 %v2514_v51, %v2516_v52 }
 0x289   : > { %v2586_v31 = vpop.f32.mrf.mxu1 }
 0x28a   : > { %3294 = vst [vmem:[#allocation23_spill] sm:$0xff] %v2586_v31  ;;  %v975_v60 = vmax.f32 %v2584_v30, %v2586_v31 }
 0x28b   : > { %v2590_v33 = vpop.f32.mrf.mxu1 }
 0x28c   : > { %3295 = vst [vmem:[#allocation24_spill] sm:$0xff] %v2590_v33  ;;  %952 = vmax.xlane.f32.xlu0 %v951_v32 }
 0x28d   : > { %v2592_v34 = vpop.f32.mrf.mxu1 }
 0x28e   : > { %3296 = vst [vmem:[#allocation25_spill] sm:$0xff] %v2592_v34  ;;  %v978_v41 = vmax.f32 %v2590_v33, %v2592_v34 }
 0x28f   : > { %v2596_v36 = vpop.f32.mrf.mxu1 }
 0x290   : > { %3297 = vst [vmem:[#allocation26_spill] sm:$0xff] %v2596_v36  ;;  %949 = vmax.xlane.f32.xlu0 %v948_v35 }
 0x291   : > { %v2598_v37 = vpop.f32.mrf.mxu1 }
 0x292   : > { %3298 = vst [vmem:[#allocation27_spill] sm:$0xff] %v2598_v37  ;;  %v981_v39 = vmax.f32 %v2596_v36, %v2598_v37 }
 0x293   : > { %v2604_v40 = vpop.f32.mrf.mxu1 }
 0x294   : > { %943 = vmax.xlane.f32.xlu0 %v942_v38  ;;  %982 = vmax.xlane.f32.xlu1 %v981_v39  ;;  %v930_v38 = vmax.f32 %v2510_v49, %v2512_v50 }
 0x295   : > { %v2608_v42 = vpop.f32.mrf.mxu1 }
 0x297   : > { %v2612_v44 = vpop.f32.mrf.mxu1 }
 0x298   : > { %940 = vmax.xlane.f32.xlu0 %v939_v43  ;;  %979 = vmax.xlane.f32.xlu1 %v978_v41  ;;  %v927_v43 = vmax.f32 %v2506_v47, %v2508_v48 }
 0x299   : > { %v2616_v6 = vpop.f32.mrf.mxu1 }
 0x29b   : > { %v2620_v12 = vpop.f32.mrf.mxu1 }
 0x29c   : > { %3299 = vst [vmem:[#allocation28_spill] sm:$0xff] %v2620_v12  ;;  %937 = vmax.xlane.f32.xlu0 %v936_v9  ;;  %976 = vmax.xlane.f32.xlu1 %v975_v60 }
 0x29d   : > { %v2624_v24 = vpop.f32.mrf.mxu1 }
 0x29e   : > { %3300 = vst [vmem:[#allocation29_spill] sm:$0xff] %v2624_v24 }
 0x29f   : > { %v2628_v32 = vpop.f32.mrf.mxu1 }
 0x2a0   : > { %3301 = vst [vmem:[#allocation30_spill] sm:$0xff] %v2628_v32  ;;  %934 = vmax.xlane.f32.xlu0 %v933_v29  ;;  %973 = vmax.xlane.f32.xlu1 %v972_v15  ;;  %v924_v15 = vmax.f32 %v2502_v45, %v2504_v46 }
 0x2a1   : > { %v2630_v35 = vpop.f32.mrf.mxu1 }
 0x2a2   : > { %3302 = vst [vmem:[#allocation31_spill] sm:$0xff] %v2630_v35  ;;  %v993_v34 = vmax.f32 %v2628_v32, %v2630_v35 }
 0x2a3   : > { %v2634_v39 = vpop.f32.mrf.mxu1 }
 0x2a4   : > { %931 = vmax.xlane.f32.xlu0 %v930_v38 }
 0x2a5   : > { %v2636_v41 = vpop.f32.mrf.mxu1 }
 0x2a7   : > { %v2640_v60 = vpop.f32.mrf.mxu1 }
 0x2a8   : > { %3303 = vst [vmem:[#allocation32_spill] sm:$0xff] %v2640_v60  ;;  %928 = vmax.xlane.f32.xlu0 %v927_v43 }
 0x2a9   : > { %v2642_v9 = vpop.f32.mrf.mxu1 }
 0x2aa   : > { %3304 = vst [vmem:[#allocation33_spill] sm:$0xff] %v2642_v9  ;;  %v999_v30 = vmax.f32 %v2640_v60, %v2642_v9 }
 0x2ab   : > { %v2646_v29 = vpop.f32.mrf.mxu1 }
 0x2ac   : > { %925 = vmax.xlane.f32.xlu0 %v924_v15 }
 0x2ad   : > { %v2648_v25 = vpop.f32.mrf.mxu1 }
 0x2ae   : > { %v1002_v38 = vmax.f32 %v2646_v29, %v2648_v25 }
 0x2af   : > { %v2652_v26 = vpop.f32.mrf.mxu1 }
 0x2b0   : > { %1003 = vmax.xlane.f32.xlu0 %v1002_v38 }
 0x2b1   : > { %v2654_v22 = vpop.f32.mrf.mxu1 }
 0x2b2   : > { %3305 = vst [vmem:[#allocation34_spill] sm:$0xff] %v2654_v22  ;;  %v1005_v43 = vmax.f32 %v2652_v26, %v2654_v22 }
 0x2b3   : > { %v2658_v23 = vpop.f32.mrf.mxu1 }
 0x2b4   : > { %1006 = vmax.xlane.f32.xlu0 %v1005_v43 }
 0x2b5   : > { %v2660_v18 = vpop.f32.mrf.mxu1 }
 0x2b6   : > { %v1008_v15 = vmax.f32 %v2658_v23, %v2660_v18 }
 0x2b7   : > { %v2664_v20 = vpop.f32.mrf.mxu1 }
 0x2b8   : > { %1009 = vmax.xlane.f32.xlu0 %v1008_v15 }
 0x2b9   : > { %v2666_v19 = vpop.f32.mrf.mxu1 }
 0x2ba   : > { %v1011_v38 = vmax.f32 %v2664_v20, %v2666_v19 }
 0x2bb   : > { %v2670_v21 = vpop.f32.mrf.mxu1 }
 0x2bc   : > { %1012 = vmax.xlane.f32.xlu0 %v1011_v38  ;;  %v996_v38 = vmax.f32 %v2634_v39, %v2636_v41 }
 0x2bd   : > { %v2672_v28 = vpop.f32.mrf.mxu1 }
 0x2be   : > { %v1014_v43 = vmax.f32 %v2670_v21, %v2672_v28 }
 0x2bf   : > { %v2676_v27 = vpop.f32.mrf.mxu1 }
 0x2c0   : > { %1015 = vmax.xlane.f32.xlu0 %v1014_v43  ;;  %v990_v43 = vmax.f32 %v2620_v12, %v2624_v24 }
 0x2c1   : > { %v2678_v31 = vpop.f32.mrf.mxu1 }
 0x2c2   : > { %v1017_v15 = vmax.f32 %v2676_v27, %v2678_v31 }
 0x2c4   : > { %1018 = vmax.xlane.f32.xlu0 %v1017_v15 }
 0x2c8   : > { %1000 = vmax.xlane.f32.xlu0 %v999_v30 }
 0x2cc   : > { %997 = vmax.xlane.f32.xlu0 %v996_v38 }
 0x2d0   : > { %994 = vmax.xlane.f32.xlu0 %v993_v34 }
 0x2d4   : > { %991 = vmax.xlane.f32.xlu0 %v990_v43 }
 0x2fd   : > { %v959_v33 = vpop.xlane.xlu0 %958 }
 0x301   : > { %v962_v37 = vpop.xlane.xlu0 %961 }
 0x302   : > { %v1044_v34 = vsub.f32 %v2554_v7, %v962_v37  ;;  %v1045_v12 = vsub.f32 %v2556_v8, %v962_v37  ;;  %v1043_v7 = vsub.f32 %v2550_v5, %v959_v33 }
 0x304   : > { %v1130_v37 = vmul.f32 1.442695, %v1043_v7 }
 0x305   : > { %v965_v36 = vpop.xlane.xlu0 %964 }
 0x306   : > { %v1046_v15 = vsub.f32 %v2560_v10, %v965_v36  ;;  %v1047_v9 = vsub.f32 %v2562_v11, %v965_v36  ;;  %v1132_v36 = vmul.f32 1.442695, %v1044_v34 }
 0x308   : > { %v1136_v30 = vmul.f32 1.442695, %v1046_v15  ;;  %v1138_v60 = vmul.f32 1.442695, %v1047_v9 }
 0x309   : > { %v968_v22 = vpop.xlane.xlu0 %967 }
 0x30a   : > { %1943 = vpow2.f32 %v1136_v30  ;;  %v1048_v38 = vsub.f32 %v2566_v13, %v968_v22  ;;  %v1049_v35 = vsub.f32 %v2568_v14, %v968_v22  ;;  %v1134_v13 = vmul.f32 1.442695, %v1045_v12 }
 0x30b   : > { %1945 = vpow2.f32 %v1138_v60  ;;  %v1042_v22 = vsub.f32 %v2548_v4, %v959_v33 }
 0x30c   : > { %v1140_v24 = vmul.f32 1.442695, %v1048_v38  ;;  %v1142_v43 = vmul.f32 1.442695, %v1049_v35 }
 0x30d   : > { %v971_v32 = vpop.xlane.xlu0 %970 }
 0x30e   : > { %1947 = vpow2.f32 %v1140_v24  ;;  %v1050_v10 = vsub.f32 %v2572_v16, %v971_v32  ;;  %v1051_v11 = vsub.f32 %v2574_v17, %v971_v32  ;;  %v1128_v17 = vmul.f32 1.442695, %v1042_v22 }
 0x30f   : > { %1949 = vpow2.f32 %v1142_v43 }
 0x310   : > { %v1144_v9 = vmul.f32 1.442695, %v1050_v10  ;;  %v1146_v15 = vmul.f32 1.442695, %v1051_v11 }
 0x311   : > { %v956_v30 = vpop.xlane.xlu0 %955 }
 0x312   : > { %1951 = vpow2.f32 %v1144_v9  ;;  %v1040_v35 = vsub.f32 %v2544_v2, %v956_v30  ;;  %v1041_v5 = vsub.f32 %v2546_v3, %v956_v30 }
 0x313   : > { %1953 = vpow2.f32 %v1146_v15 }
 0x314   : > { %1955 = vpow2.f32 %v1132_v36  ;;  %v1124_v34 = vmul.f32 1.442695, %v1040_v35  ;;  %v1126_v11 = vmul.f32 1.442695, %v1041_v5 }
 0x315   : > { %1957 = vpow2.f32 %v1134_v13  ;;  %v953_v8 = vpop.xlane.xlu0 %952 }
 0x316   : > { %1959 = vpow2.f32 %v1128_v17  ;;  %v1038_v10 = vsub.f32 %v2540_v63, %v953_v8  ;;  %v1039_v36 = vsub.f32 %v2542_v1, %v953_v8 }
 0x317   : > { %v2700_v14 = vpop.eup %1943  ;;  %1961 = vpow2.f32 %v1130_v37  ;;  %v947_v37 = vpop.xlane.xlu1 %946 }
 0x318   : > { %v2702_v16 = vpop.eup %1945  ;;  %1963 = vpow2.f32 %v1124_v34  ;;  %v1120_v22 = vmul.f32 1.442695, %v1038_v10  ;;  %v1122_v1 = vmul.f32 1.442695, %v1039_v36 }
 0x319   : > { %v950_v24 = vpop.xlane.xlu0 %949  ;;  %v1251_v12 = vadd.f32 %v2702_v16, %v2700_v14  ;;  %1965 = vpow2.f32 %v1126_v11 }
 0x31a   : > { %v1036_v63 = vsub.f32 %v2536_v61, %v950_v24  ;;  %v1037_v8 = vsub.f32 %v2538_v62, %v950_v24  ;;  %v1035_v61 = vsub.f32 %v2532_v59, %v947_v37  ;;  %v987_v62 = vmax.f32 %v2612_v44, %v2616_v6 }
 0x31b   : > { %v2706_v32 = vpop.eup %1947  ;;  %1252 = vadd.xlane.f32.xlu0 %v1251_v12 }
 0x31c   : > { %v2709_v4 = vpop.eup %1949 }
 0x31d   : > { %v944_v33 = vpop.xlane.xlu0 %943  ;;  %v1254_v60 = vadd.f32 %v2709_v4, %v2706_v32 }
 0x31e   : > { %v1032_v10 = vsub.f32 %v2526_v56, %v944_v33  ;;  %v1033_v36 = vsub.f32 %v2528_v57, %v944_v33 }
 0x31f   : > { %v2714_v38 = vpop.eup %1951  ;;  %1255 = vadd.xlane.f32.xlu0 %v1254_v60  ;;  %v1118_v60 = vmul.f32 1.442695, %v1037_v8 }
 0x320   : > { %v2716_v43 = vpop.eup %1953  ;;  %v1110_v56 = vmul.f32 1.442695, %v1033_v36 }
 0x321   : > { %v2719_v2 = vpop.eup %1955  ;;  %v941_v9 = vpop.xlane.xlu0 %940  ;;  %v1257_v3 = vadd.f32 %v2716_v43, %v2714_v38 }
 0x322   : > { %v2724_v15 = vpop.eup %1957  ;;  %v1030_v13 = vsub.f32 %v2522_v54, %v941_v9  ;;  %v1031_v30 = vsub.f32 %v2524_v55, %v941_v9  ;;  %v1034_v54 = vsub.f32 %v2530_v58, %v947_v37  ;;  %v1116_v55 = vmul.f32 1.442695, %v1036_v63 }
 0x323   : > { %1258 = vadd.xlane.f32.xlu0 %v1257_v3  ;;  %v1248_v35 = vadd.f32 %v2724_v15, %v2719_v2  ;;  %v2733_v5 = vpop.eup %1959  ;;  %v1108_v63 = vmul.f32 1.442695, %v1032_v10 }
 0x324   : > { %v1104_v7 = vmul.f32 1.442695, %v1030_v13  ;;  %v1106_v17 = vmul.f32 1.442695, %v1031_v30  ;;  %v2738_v24 = vpop.eup %1961  ;;  %v1112_v9 = vmul.f32 1.442695, %v1034_v54 }
 0x325   : > { %v938_v12 = vpop.xlane.xlu0 %937  ;;  %v1114_v13 = vmul.f32 1.442695, %v1035_v61 }
 0x326   : > { %1967 = vpow2.f32 %v1104_v7  ;;  %v1029_v57 = vsub.f32 %v2520_v53, %v938_v12  ;;  %v984_v7 = vmax.f32 %v2604_v40, %v2608_v42 }
 0x327   : > { %1969 = vpow2.f32 %v1106_v17  ;;  %1249 = vadd.xlane.f32.xlu0 %v1248_v35 }
 0x328   : > { %1971 = vpow2.f32 %v1120_v22  ;;  %v1245_v22 = vadd.f32 %v2738_v24, %v2733_v5  ;;  %v1102_v61 = vmul.f32 1.442695, %v1029_v57 }
 0x329   : > { %1973 = vpow2.f32 %v1122_v1  ;;  %v935_v34 = vpop.xlane.xlu0 %934 }
 0x32a   : > { %v1026_v11 = vsub.f32 %v2514_v51, %v935_v34  ;;  %v1027_v58 = vsub.f32 %v2516_v52, %v935_v34  ;;  %1975 = vpow2.f32 %v1116_v55  ;;  %v2746_v51 = vpop.eup %1963  ;;  %v1028_v52 = vsub.f32 %v2518_v0, %v938_v12 }
 0x32b   : > { %988 = vmax.xlane.f32.xlu0 %v987_v62  ;;  %1977 = vpow2.f32 %v1118_v60  ;;  %v2752_v17 = vpop.eup %1965 }
 0x32c   : > { %v1096_v59 = vmul.f32 1.442695, %v1026_v11  ;;  %v1098_v3 = vmul.f32 1.442695, %v1027_v58  ;;  %v1100_v0 = vmul.f32 1.442695, %v1028_v52 }
 0x32d   : > { %v932_v30 = vpop.xlane.xlu0 %931 }
 0x32e   : > { %1979 = vpow2.f32 %v1096_v59  ;;  %v1024_v53 = vsub.f32 %v2510_v49, %v932_v30  ;;  %v1025_v60 = vsub.f32 %v2512_v50, %v932_v30 }
 0x32f   : > { %1981 = vpow2.f32 %v1098_v3  ;;  %1246 = vadd.xlane.f32.xlu0 %v1245_v22 }
 0x330   : > { %1983 = vpow2.f32 %v1112_v9  ;;  %v1092_v49 = vmul.f32 1.442695, %v1024_v53  ;;  %v1094_v50 = vmul.f32 1.442695, %v1025_v60 }
 0x331   : > { %1985 = vpow2.f32 %v1114_v13  ;;  %v929_v33 = vpop.xlane.xlu0 %928 }
 0x332   : > { %1987 = vpow2.f32 %v1108_v63  ;;  %v1022_v37 = vsub.f32 %v2506_v47, %v929_v33  ;;  %v1023_v1 = vsub.f32 %v2508_v48, %v929_v33  ;;  %v1242_v48 = vadd.f32 %v2752_v17, %v2746_v51 }
 0x333   : > { %v2756_v8 = vpop.eup %1967  ;;  %1989 = vpow2.f32 %v1110_v56  ;;  %985 = vmax.xlane.f32.xlu0 %v984_v7 }
 0x334   : > { %v2758_v35 = vpop.eup %1969  ;;  %v1088_v12 = vmul.f32 1.442695, %v1022_v37  ;;  %v1090_v54 = vmul.f32 1.442695, %v1023_v1 }
 0x335   : > { %v2761_v55 = vpop.eup %1971  ;;  %v926_v34 = vpop.xlane.xlu0 %925  ;;  %v1227_v47 = vadd.f32 %v2758_v35, %v2756_v8 }
 0x336   : > { %v2768_v62 = vpop.eup %1973  ;;  %1991 = vpow2.f32 %v1088_v12  ;;  %v1020_v10 = vsub.f32 %v2502_v45, %v926_v34  ;;  %v1021_v58 = vsub.f32 %v2504_v46, %v926_v34 }
 0x337   : > { %1993 = vpow2.f32 %v1090_v54  ;;  %1228 = vadd.xlane.f32.xlu1 %v1227_v47  ;;  %1243 = vadd.xlane.f32.xlu0 %v1242_v48  ;;  %v2771_v11 = vpop.eup %1975  ;;  %v1239_v9 = vadd.f32 %v2768_v62, %v2761_v55 }
 0x338   : > { %1995 = vpow2.f32 %v1100_v0  ;;  %v2776_v59 = vpop.eup %1977  ;;  %v1084_v30 = vmul.f32 1.442695, %v1020_v10  ;;  %v1086_v22 = vmul.f32 1.442695, %v1021_v58 }
 0x339   : > { %1997 = vpow2.f32 %v1102_v61  ;;  %v1004_v36 = vpop.xlane.xlu0 %1003  ;;  %v1236_v56 = vadd.f32 %v2776_v59, %v2771_v11 }
 0x33a   : > { %1999 = vpow2.f32 %v1092_v49  ;;  %v1072_v0 = vsub.f32 %v2646_v29, %v1004_v36  ;;  %v1073_v54 = vsub.f32 %v2648_v25, %v1004_v36 }
 0x33b   : > { %v2778_v3 = vpop.eup %1979  ;;  %1240 = vadd.xlane.f32.xlu0 %v1239_v9  ;;  %2001 = vpow2.f32 %v1094_v50 }
 0x33c   : > { %v2780_v13 = vpop.eup %1981  ;;  %2003 = vpow2.f32 %v1084_v30  ;;  %v1188_v48 = vmul.f32 1.442695, %v1072_v0  ;;  %v1190_v10 = vmul.f32 1.442695, %v1073_v54 }
 0x33d   : > { %v2782_v45 = vpop.eup %1983  ;;  %v2784_v63 = vpop.xlane.xlu0 %1006  ;;  %v1221_v46 = vadd.f32 %v2780_v13, %v2778_v3  ;;  %2005 = vpow2.f32 %v1086_v22 }
 0x33e   : > { %v2790_v52 = vpop.eup %1985  ;;  %2007 = vpow2.f32 %v1188_v48 }
 0x33f   : > { %v2792_v57 = vpop.eup %1987  ;;  %1222 = vadd.xlane.f32.xlu1 %v1221_v46  ;;  %1237 = vadd.xlane.f32.xlu0 %v1236_v56  ;;  %v1233_v37 = vadd.f32 %v2790_v52, %v2782_v45  ;;  %2009 = vpow2.f32 %v1190_v10 }
 0x340   : > { %v2794_v33 = vpop.eup %1989 }
 0x341   : > { %v1010_v7 = vpop.xlane.xlu0 %1009  ;;  %v1230_v34 = vadd.f32 %v2794_v33, %v2792_v57 }
 0x342   : > { %v1076_v29 = vsub.f32 %v2658_v23, %v1010_v7  ;;  %v1077_v50 = vsub.f32 %v2660_v18, %v1010_v7 }
 0x343   : > { %v2798_v1 = vpop.eup %1991  ;;  %1234 = vadd.xlane.f32.xlu0 %v1233_v37 }
 0x344   : > { %v2801_v53 = vpop.eup %1993  ;;  %v1196_v22 = vmul.f32 1.442695, %v1076_v29  ;;  %v1198_v18 = vmul.f32 1.442695, %v1077_v50 }
 0x345   : > { %v2803_v12 = vpop.eup %1995  ;;  %v1013_v61 = vpop.xlane.xlu0 %1012  ;;  %v1215_v60 = vadd.f32 %v2801_v53, %v2798_v1 }
 0x346   : > { %v2810_v47 = vpop.eup %1997  ;;  %v1078_v23 = vsub.f32 %v2664_v20, %v1013_v61  ;;  %v1079_v7 = vsub.f32 %v2666_v19, %v1013_v61  ;;  %v1074_v20 = vsub.f32 %v2652_v26, %v2784_v63  ;;  %v3306_v61 = vld [vmem:[#allocation34_spill] sm:$0xff]  ;;  %v3307_v26 = vld [vmem:[#allocation32_spill] sm:$0xff] }
 0x347   : > { %1216 = vadd.xlane.f32.xlu1 %v1215_v60  ;;  %1231 = vadd.xlane.f32.xlu0 %v1230_v34  ;;  %v2813_v49 = vpop.eup %1999  ;;  %v1224_v58 = vadd.f32 %v2810_v47, %v2803_v12  ;;  %v1075_v29 = vsub.f32 %v3306_v61, %v2784_v63 }
 0x348   : > { %v2818_v36 = vpop.eup %2001  ;;  %v1200_v34 = vmul.f32 1.442695, %v1078_v23  ;;  %v1202_v10 = vmul.f32 1.442695, %v1079_v7 }
 0x349   : > { %v1016_v25 = vpop.xlane.xlu0 %1015  ;;  %v2823_v37 = vpop.eup %2003  ;;  %v1218_v54 = vadd.f32 %v2818_v36, %v2813_v49 }
 0x34a   : > { %v1080_v9 = vsub.f32 %v2670_v21, %v1016_v25  ;;  %v1081_v30 = vsub.f32 %v2672_v28, %v1016_v25  ;;  %v2828_v21 = vpop.eup %2005 }
 0x34b   : > { %1225 = vadd.xlane.f32.xlu0 %v1224_v58  ;;  %v1194_v58 = vmul.f32 1.442695, %v1075_v29 }
 0x34c   : > { %v1204_v46 = vmul.f32 1.442695, %v1080_v9  ;;  %v1206_v56 = vmul.f32 1.442695, %v1081_v30  ;;  %v3308_v9 = vld [vmem:[#allocation33_spill] sm:$0xff] }
 0x34d   : > { %v1019_v0 = vpop.xlane.xlu0 %1018 }
 0x34e   : > { %2011 = vpow2.f32 %v1204_v46  ;;  %v1082_v28 = vsub.f32 %v2676_v27, %v1019_v0  ;;  %v1083_v60 = vsub.f32 %v2678_v31, %v1019_v0  ;;  %v1212_v27 = vadd.f32 %v2828_v21, %v2823_v37  ;;  %v2842_v46 = vpop.eup %2007 }
 0x34f   : > { %2013 = vpow2.f32 %v1206_v56  ;;  %1219 = vadd.xlane.f32.xlu0 %v1218_v54  ;;  %v1192_v31 = vmul.f32 1.442695, %v1074_v20 }
 0x350   : > { %2015 = vpow2.f32 %v1196_v22  ;;  %v1208_v48 = vmul.f32 1.442695, %v1082_v28  ;;  %v1210_v19 = vmul.f32 1.442695, %v1083_v60  ;;  %v2844_v28 = vpop.eup %2009  ;;  %v3309_v60 = vld [vmem:[#allocation30_spill] sm:$0xff] }
 0x351   : > { %2017 = vpow2.f32 %v1198_v18  ;;  %v1001_v50 = vpop.xlane.xlu0 %1000 }
 0x352   : > { %2019 = vpow2.f32 %v1208_v48  ;;  %v1070_v25 = vsub.f32 %v3307_v26, %v1001_v50  ;;  %v1071_v30 = vsub.f32 %v3308_v9, %v1001_v50 }
 0x353   : > { %2021 = vpow2.f32 %v1210_v19  ;;  %1213 = vadd.xlane.f32.xlu0 %v1212_v27 }
 0x354   : > { %2023 = vpow2.f32 %v1200_v34  ;;  %v1184_v56 = vmul.f32 1.442695, %v1070_v25  ;;  %v1186_v0 = vmul.f32 1.442695, %v1071_v30  ;;  %v3310_v34 = vld [vmem:[#allocation31_spill] sm:$0xff]  ;;  %v3312_v25 = vld [vmem:[#allocation29_spill] sm:$0xff] }
 0x355   : > { %2025 = vpow2.f32 %v1202_v10  ;;  %v998_v22 = vpop.xlane.xlu0 %997 }
 0x356   : > { %v1068_v63 = vsub.f32 %v2634_v39, %v998_v22  ;;  %v1069_v23 = vsub.f32 %v2636_v41, %v998_v22  ;;  %2027 = vpow2.f32 %v1192_v31  ;;  %v3311_v31 = vld [vmem:[#allocation28_spill] sm:$0xff] }
 0x357   : > { %2029 = vpow2.f32 %v1194_v58 }
 0x358   : > { %v1180_v18 = vmul.f32 1.442695, %v1068_v63  ;;  %v1182_v7 = vmul.f32 1.442695, %v1069_v23 }
 0x359   : > { %v995_v54 = vpop.xlane.xlu0 %994 }
 0x35a   : > { %2031 = vpow2.f32 %v1180_v18  ;;  %v1066_v20 = vsub.f32 %v3309_v60, %v995_v54  ;;  %v1067_v48 = vsub.f32 %v3310_v34, %v995_v54  ;;  %v1290_v54 = vadd.f32 %v2844_v28, %v2842_v46 }
 0x35b   : > { %v2848_v19 = vpop.eup %2011  ;;  %2033 = vpow2.f32 %v1182_v7 }
 0x35c   : > { %v2850_v39 = vpop.eup %2013  ;;  %2035 = vpow2.f32 %v1184_v56  ;;  %v1176_v41 = vmul.f32 1.442695, %v1066_v20  ;;  %v1178_v29 = vmul.f32 1.442695, %v1067_v48 }
 0x35d   : > { %v2852_v61 = vpop.eup %2015  ;;  %2037 = vpow2.f32 %v1186_v0  ;;  %v992_v10 = vpop.xlane.xlu0 %991  ;;  %v1302_v50 = vadd.f32 %v2850_v39, %v2848_v19 }
 0x35e   : > { %v2856_v27 = vpop.eup %2017  ;;  %v1064_v26 = vsub.f32 %v3311_v31, %v992_v10  ;;  %v1065_v58 = vsub.f32 %v3312_v25, %v992_v10  ;;  %2039 = vpow2.f32 %v1176_v41 }
 0x35f   : > { %v2860_v9 = vpop.eup %2019  ;;  %1303 = vadd.xlane.f32.xlu0 %v1302_v50  ;;  %2041 = vpow2.f32 %v1178_v29  ;;  %v1296_v56 = vadd.f32 %v2856_v27, %v2852_v61 }
 0x360   : > { %v2862_v30 = vpop.eup %2021  ;;  %v1172_v22 = vmul.f32 1.442695, %v1064_v26  ;;  %v1174_v63 = vmul.f32 1.442695, %v1065_v58 }
 0x361   : > { %v2864_v23 = vpop.eup %2023  ;;  %v1305_v18 = vadd.f32 %v2862_v30, %v2860_v9 }
 0x362   : > { %v2870_v7 = vpop.eup %2025  ;;  %2043 = vpow2.f32 %v1172_v22 }
 0x363   : > { %2045 = vpow2.f32 %v1174_v63  ;;  %1297 = vadd.xlane.f32.xlu0 %v1296_v56  ;;  %1306 = vadd.xlane.f32.xlu1 %v1305_v18  ;;  %v2872_v0 = vpop.eup %2027  ;;  %v1299_v60 = vadd.f32 %v2870_v7, %v2864_v23 }
 0x364   : > { %3313 = vst [vmem:[#allocation34_spill] sm:$0xff] %v2872_v0  ;;  %v2878_v20 = vpop.eup %2029 }
 0x365   : > { %3314 = vst [vmem:[#allocation32_spill] sm:$0xff] %v2878_v20  ;;  %v1293_v29 = vadd.f32 %v2878_v20, %v2872_v0  ;;  %v3326_v0 = vld [vmem:[#allocation25_spill] sm:$0xff] }
 0x367   : > { %v2880_v34 = vpop.eup %2031  ;;  %1291 = vadd.xlane.f32.xlu0 %v1290_v54  ;;  %1300 = vadd.xlane.f32.xlu1 %v1299_v60  ;;  %v983_v54 = vpop.xlane.xlu1 %982 }
 0x368   : > { %3315 = vst [vmem:[#allocation33_spill] sm:$0xff] %v2880_v34  ;;  %v2882_v48 = vpop.eup %2033 }
 0x369   : > { %3316 = vst [vmem:[#allocation30_spill] sm:$0xff] %v2882_v48  ;;  %v2884_v41 = vpop.eup %2035  ;;  %v1284_v10 = vadd.f32 %v2882_v48, %v2880_v34  ;;  %v3325_v34 = vld [vmem:[#allocation24_spill] sm:$0xff] }
 0x36a   : > { %3317 = vst [vmem:[#allocation31_spill] sm:$0xff] %v2884_v41  ;;  %v2890_v50 = vpop.eup %2037 }
 0x36b   : > { %3318 = vst [vmem:[#allocation28_spill] sm:$0xff] %v2890_v50  ;;  %1294 = vadd.xlane.f32.xlu1 %v1293_v29  ;;  %1285 = vadd.xlane.f32.xlu0 %v1284_v10  ;;  %v2892_v31 = vpop.eup %2039  ;;  %v1287_v26 = vadd.f32 %v2890_v50, %v2884_v41  ;;  %v980_v10 = vpop.xlane.xlu1 %979 }
 0x36c   : > { %3319 = vst [vmem:[#allocation29_spill] sm:$0xff] %v2892_v31  ;;  %v2896_v25 = vpop.eup %2041  ;;  %v1056_v48 = vsub.f32 %v3325_v34, %v980_v10 }
 0x36d   : > { %3320 = vst [vmem:[#allocation35_spill] sm:$0xff] %v2896_v25  ;;  %v1281_v63 = vadd.f32 %v2896_v25, %v2892_v31  ;;  %v3324_v31 = vld [vmem:[#allocation27_spill] sm:$0xff] }
 0x36e   : > { %v1059_v25 = vsub.f32 %v3324_v31, %v983_v54 }
 0x36f   : > { %v2898_v58 = vpop.eup %2043  ;;  %1288 = vadd.xlane.f32.xlu1 %v1287_v26  ;;  %v3323_v26 = vld [vmem:[#allocation26_spill] sm:$0xff] }
 0x370   : > { %3321 = vst [vmem:[#allocation36_spill] sm:$0xff] %v2898_v58  ;;  %v2900_v22 = vpop.eup %2045  ;;  %v1058_v41 = vsub.f32 %v3323_v26, %v983_v54  ;;  %v1057_v26 = vsub.f32 %v3326_v0, %v980_v10 }
 0x371   : > { %3322 = vst [vmem:[#allocation37_spill] sm:$0xff] %v2900_v22  ;;  %v1278_v56 = vadd.f32 %v2900_v22, %v2898_v58  ;;  %v977_v58 = vpop.xlane.xlu1 %976  ;;  %v1162_v22 = vmul.f32 1.442695, %v1059_v25  ;;  %v3328_v25 = vld [vmem:[#allocation23_spill] sm:$0xff] }
 0x372   : > { %v1055_v54 = vsub.f32 %v3328_v25, %v977_v58 }
 0x373   : > { %1282 = vadd.xlane.f32.xlu1 %v1281_v63  ;;  %1279 = vadd.xlane.f32.xlu0 %v1278_v56  ;;  %v1160_v56 = vmul.f32 1.442695, %v1058_v41 }
 0x3a4   : > { %v1253_v18 = vpop.xlane.xlu0 %1252 }
 0x3a5   : > { %2047 = vrcp.f32 %v1253_v18 }
 0x3a8   : > { %v1256_v60 = vpop.xlane.xlu0 %1255 }
 0x3a9   : > { %2049 = vrcp.f32 %v1256_v60 }
 0x3ac   : > { %v1259_v29 = vpop.xlane.xlu0 %1258 }
 0x3ad   : > { %2051 = vrcp.f32 %v1259_v29 }
 0x3b0   : > { %v1250_v50 = vpop.xlane.xlu0 %1249 }
 0x3b1   : > { %2053 = vrcp.f32 %v1250_v50  ;;  %v1156_v50 = vmul.f32 1.442695, %v1056_v48  ;;  %v1154_v48 = vmul.f32 1.442695, %v1055_v54 }
 0x3b2   : > { %v2048_v63 = vpop.eup %2047  ;;  %2055 = vpow2.f32 %v1160_v56 }
 0x3b3   : > { %v2913_v18 = vmul.f32 %v2048_v63, %v2702_v16  ;;  %v2916_v60 = vmul.f32 %v2048_v63, %v2700_v14  ;;  %v3327_v16 = vld [vmem:[#allocation22_spill] sm:$0xff]  ;;  %2057 = vpow2.f32 %v1162_v22  ;;  %v1158_v63 = vmul.f32 1.442695, %v1057_v26 }
 0x3b4   : > { %v989_v29 = vpop.xlane.xlu0 %988  ;;  %v1054_v34 = vsub.f32 %v3327_v16, %v977_v58 }
 0x3b5   : > { %v1062_v20 = vsub.f32 %v2612_v44, %v989_v29  ;;  %v1063_v31 = vsub.f32 %v2616_v6, %v989_v29  ;;  %1431 = vst [vmem:[%s2922_s15 + $0xd8] sm:$0xff] %v2913_v18  ;;  %1430 = vst [vmem:[%s2922_s15 + $0xd0] sm:$0xff] %v2916_v60 }
 0x3b6   : > { %v2050_v14 = vpop.eup %2049  ;;  %v1152_v56 = vmul.f32 1.442695, %v1054_v34  ;;  %v3330_v34 = vld [vmem:[#allocation21_spill] sm:$0xff] }
 0x3b7   : > { %v1168_v41 = vmul.f32 1.442695, %v1062_v20  ;;  %v1170_v0 = vmul.f32 1.442695, %v1063_v31  ;;  %v1369_v44 = vmul.f32 %v2050_v14, %v2709_v4  ;;  %v1368_v6 = vmul.f32 %v2050_v14, %v2706_v32  ;;  %v974_v20 = vpop.xlane.xlu1 %973  ;;  %v3329_v14 = vld [vmem:[#allocation20_spill] sm:$0xff] }
 0x3b8   : > { %v1247_v10 = vpop.xlane.xlu0 %1246 }
 0x3b9   : > { %2059 = vpow2.f32 %v1168_v41  ;;  %1433 = vst [vmem:[%s2922_s15 + $0xe8] sm:$0xff] %v1369_v44  ;;  %1432 = vst [vmem:[%s2922_s15 + $0xe0] sm:$0xff] %v1368_v6  ;;  %v1053_v41 = vsub.f32 %v3330_v34, %v974_v20 }
 0x3ba   : > { %v2052_v29 = vpop.eup %2051  ;;  %2061 = vpow2.f32 %v1170_v0 }
 0x3bb   : > { %2063 = vrcp.f32 %v1247_v10  ;;  %v1371_v4 = vmul.f32 %v2052_v29, %v2716_v43  ;;  %v1370_v32 = vmul.f32 %v2052_v29, %v2714_v38  ;;  %v1052_v43 = vsub.f32 %v3329_v14, %v974_v20 }
 0x3bc   : > { %2065 = vpow2.f32 %v1156_v50  ;;  %v986_v22 = vpop.xlane.xlu0 %985 }
 0x3bd   : > { %2067 = vpow2.f32 %v1158_v63  ;;  %v1060_v58 = vsub.f32 %v2604_v40, %v986_v22  ;;  %v1061_v26 = vsub.f32 %v2608_v42, %v986_v22  ;;  %1435 = vst [vmem:[%s2922_s15 + $0xf8] sm:$0xff] %v1371_v4  ;;  %1476 = vmatprep.subr.mxu0 %v1371_v4  ;;  %1813 = vmatprep.subr.mxu1 %v1371_v4  ;;  %1434 = vst [vmem:[%s2922_s15 + $0xf0] sm:$0xff] %v1370_v32 }
 0x3be   : > { %v2054_v31 = vpop.eup %2053  ;;  %2069 = vpow2.f32 %v1152_v56  ;;  %1477 = vmatpush1.xpose.msra.mxu0 %v1370_v32  ;;  %1845 = vmatpush1.xpose.msra.mxu1 %v1370_v32  ;;  %v1148_v54 = vmul.f32 1.442695, %v1052_v43 }
 0x3bf   : > { %v1164_v38 = vmul.f32 1.442695, %v1060_v58  ;;  %v1166_v16 = vmul.f32 1.442695, %v1061_v26  ;;  %1478 = vmatprep.subr.mxu0 %v1369_v44  ;;  %1814 = vmatprep.subr.mxu1 %v1369_v44  ;;  %v1365_v40 = vmul.f32 %v2054_v31, %v2724_v15  ;;  %v1364_v42 = vmul.f32 %v2054_v31, %v2719_v2  ;;  %v2946_v25 = vpop.eup %2055 }
 0x3c0   : > { %2071 = vpow2.f32 %v1154_v48  ;;  %v1229_v0 = vpop.xlane.xlu1 %1228  ;;  %v1244_v50 = vpop.xlane.xlu0 %1243  ;;  %v1150_v2 = vmul.f32 1.442695, %v1053_v41 }
 0x3c1   : > { %2073 = vpow2.f32 %v1164_v38  ;;  %1429 = vst [vmem:[%s2922_s15 + $0xc8] sm:$0xff] %v1365_v40  ;;  %1428 = vst [vmem:[%s2922_s15 + $0xc0] sm:$0xff] %v1364_v42  ;;  %v2950_v44 = vpop.eup %2057 }
 0x3c2   : > { %2075 = vpow2.f32 %v1166_v16  ;;  %1479 = vmatpush1.xpose.msra.mxu0 %v1368_v6  ;;  %1846 = vmatpush1.xpose.msra.mxu1 %v1368_v6  ;;  %v1269_v58 = vadd.f32 %v2950_v44, %v2946_v25 }
 0x3c3   : > { %2077 = vrcp.f32 %v1229_v0  ;;  %1480 = vmatprep.subr.mxu0 %v2913_v18  ;;  %1815 = vmatprep.subr.mxu1 %v2913_v18 }
 0x3c4   : > { %2079 = vrcp.f32 %v1244_v50  ;;  %v1241_v15 = vpop.xlane.xlu0 %1240 }
 0x3c5   : > { %2081 = vrcp.f32 %v1241_v15 }
 0x3c6   : > { %v2952_v10 = vpop.eup %2059  ;;  %1481 = vmatpush1.xpose.msra.mxu0 %v2916_v60  ;;  %1847 = vmatpush1.xpose.msra.mxu1 %v2916_v60  ;;  %2083 = vpow2.f32 %v1148_v54 }
 0x3c7   : > { %v2956_v6 = vpop.eup %2061  ;;  %1482 = vmatprep.subr.mxu0 %v1365_v40  ;;  %1816 = vmatprep.subr.mxu1 %v1365_v40  ;;  %2085 = vpow2.f32 %v1150_v2 }
 0x3c8   : > { %v2064_v63 = vpop.eup %2063  ;;  %v1223_v18 = vpop.xlane.xlu1 %1222  ;;  %v1275_v56 = vadd.f32 %v2956_v6, %v2952_v10 }
 0x3c9   : > { %v1238_v29 = vpop.xlane.xlu0 %1237  ;;  %v2960_v20 = vpop.eup %2065  ;;  %2087 = vrcp.f32 %v1223_v18  ;;  %v1363_v4 = vmul.f32 %v2064_v63, %v2738_v24  ;;  %v1362_v60 = vmul.f32 %v2064_v63, %v2733_v5 }
 0x3ca   : > { %v2964_v32 = vpop.eup %2067  ;;  %2089 = vrcp.f32 %v1238_v29  ;;  %1276 = vadd.xlane.f32.xlu1 %v1275_v56  ;;  %1483 = vmatpush1.xpose.msra.mxu0 %v1364_v42 }
 0x3cb   : > { %v2966_v48 = vpop.eup %2069  ;;  %1848 = vmatpush1.xpose.msra.mxu1 %v1364_v42  ;;  %1427 = vst [vmem:[%s2922_s15 + $0xb8] sm:$0xff] %v1363_v4  ;;  %1484 = vmatprep.subr.mxu0 %v1363_v4  ;;  %1426 = vst [vmem:[%s2922_s15 + $0xb0] sm:$0xff] %v1362_v60 }
 0x3cc   : > { %1817 = vmatprep.subr.mxu1 %v1363_v4 }
 0x3cd   : > { %v1235_v22 = vpop.xlane.xlu0 %1234  ;;  %v2972_v26 = vpop.eup %2071 }
 0x3ce   : > { %2091 = vrcp.f32 %v1235_v22  ;;  %v2974_v5 = vpop.eup %2073  ;;  %1270 = vadd.xlane.f32.xlu1 %v1269_v58  ;;  %1485 = vmatpush1.xpose.msra.mxu0 %v1362_v60  ;;  %v1263_v38 = vadd.f32 %v2972_v26, %v2966_v48 }
 0x3cf   : > { %v2976_v24 = vpop.eup %2075  ;;  %1849 = vmatpush1.xpose.msra.mxu1 %v1362_v60 }
 0x3d0   : > { %v2078_v31 = vpop.eup %2077  ;;  %v1217_v14 = vpop.xlane.xlu1 %1216  ;;  %v1272_v16 = vadd.f32 %v2976_v24, %v2974_v5 }
 0x3d1   : > { %v1232_v43 = vpop.xlane.xlu0 %1231  ;;  %v2080_v40 = vpop.eup %2079  ;;  %2093 = vrcp.f32 %v1217_v14  ;;  %v2983_v42 = vmul.f32 %v2078_v31, %v2758_v35  ;;  %v2986_v34 = vmul.f32 %v2078_v31, %v2756_v8  ;;  %v272_v14 = vld [vmem:[%s3252_s2 + $0x8] sm:$0xff] }
 0x3d2   : > { %v2082_v41 = vpop.eup %2081  ;;  %2095 = vrcp.f32 %v1232_v43  ;;  %1264 = vadd.xlane.f32.xlu1 %v1263_v38  ;;  %1273 = vadd.xlane.f32.xlu0 %v1272_v16  ;;  %v1361_v0 = vmul.f32 %v2080_v40, %v2752_v17  ;;  %v1360_v50 = vmul.f32 %v2080_v40, %v2746_v51  ;;  %v1266_v51 = vadd.f32 %v2964_v32, %v2960_v20  ;;  %v274_v16 = vld [vmem:[%s3252_s2 + $0x18] sm:$0xff] }
 0x3d3   : > { %v1359_v54 = vmul.f32 %v2082_v41, %v2768_v62  ;;  %v1358_v2 = vmul.f32 %v2082_v41, %v2761_v55  ;;  %1415 = vst [vmem:[%s2922_s15 + $0x58] sm:$0xff] %v2983_v42  ;;  %1414 = vst [vmem:[%s2922_s15 + $0x50] sm:$0xff] %v2986_v34  ;;  %v2996_v8 = vpop.eup %2083 }
 0x3d4   : > { %1425 = vst [vmem:[%s2922_s15 + $0xa8] sm:$0xff] %v1361_v0  ;;  %1486 = vmatprep.subr.mxu0 %v1361_v0  ;;  %1818 = vmatprep.subr.mxu1 %v1361_v0  ;;  %1424 = vst [vmem:[%s2922_s15 + $0xa0] sm:$0xff] %v1360_v50  ;;  %v3002_v17 = vpop.eup %2085 }
 0x3d5   : > { %v1226_v35 = vpop.xlane.xlu0 %1225  ;;  %1487 = vmatpush1.xpose.msra.mxu0 %v1360_v50  ;;  %1850 = vmatpush1.xpose.msra.mxu1 %v1360_v50  ;;  %1423 = vst [vmem:[%s2922_s15 + $0x98] sm:$0xff] %v1359_v54  ;;  %1422 = vst [vmem:[%s2922_s15 + $0x90] sm:$0xff] %v1358_v2  ;;  %v1260_v29 = vadd.f32 %v3002_v17, %v2996_v8 }
 0x3d6   : > { %2097 = vrcp.f32 %v1226_v35  ;;  %v2088_v55 = vpop.eup %2087  ;;  %1267 = vadd.xlane.f32.xlu0 %v1266_v51  ;;  %1488 = vmatprep.subr.mxu0 %v1359_v54 }
 0x3d7   : > { %v2090_v62 = vpop.eup %2089  ;;  %1819 = vmatprep.subr.mxu1 %v1359_v54  ;;  %v3007_v15 = vmul.f32 %v2088_v55, %v2780_v13  ;;  %v3010_v63 = vmul.f32 %v2088_v55, %v2778_v3 }
 0x3d8   : > { %v1357_v56 = vmul.f32 %v2090_v62, %v2776_v59  ;;  %v1356_v4 = vmul.f32 %v2090_v62, %v2771_v11 }
 0x3d9   : > { %v1220_v18 = vpop.xlane.xlu0 %1219  ;;  %1489 = vmatpush1.xpose.msra.mxu0 %v1358_v2  ;;  %1851 = vmatpush1.xpose.msra.mxu1 %v1358_v2  ;;  %1411 = vst [vmem:[%s2922_s15 + $0x38] sm:$0xff] %v3007_v15  ;;  %1410 = vst [vmem:[%s2922_s15 + $0x30] sm:$0xff] %v3010_v63 }
 0x3da   : > { %2099 = vrcp.f32 %v1220_v18  ;;  %1261 = vadd.xlane.f32.xlu0 %v1260_v29  ;;  %1421 = vst [vmem:[%s2922_s15 + $0x88] sm:$0xff] %v1357_v56  ;;  %1490 = vmatprep.subr.mxu0 %v1357_v56  ;;  %1420 = vst [vmem:[%s2922_s15 + $0x80] sm:$0xff] %v1356_v4 }
 0x3db   : > { %v2092_v13 = vpop.eup %2091  ;;  %1820 = vmatprep.subr.mxu1 %v1357_v56 }
 0x3dc   : > { %v1355_v3 = vmul.f32 %v2092_v13, %v2790_v52  ;;  %v1354_v59 = vmul.f32 %v2092_v13, %v2782_v45 }
 0x3dd   : > { %v1214_v11 = vpop.xlane.xlu0 %1213  ;;  %1491 = vmatpush1.xpose.msra.mxu0 %v1356_v4  ;;  %1852 = vmatpush1.xpose.msra.mxu1 %v1356_v4 }
 0x3de   : > { %2101 = vrcp.f32 %v1214_v11  ;;  %1419 = vst [vmem:[%s2922_s15 + $0x78] sm:$0xff] %v1355_v3  ;;  %1418 = vst [vmem:[%s2922_s15 + $0x70] sm:$0xff] %v1354_v59  ;;  %v2094_v60 = vpop.eup %2093  ;;  %1492 = vmatprep.subr.mxu0 %v1355_v3  ;;  %1821 = vmatprep.subr.mxu1 %v1355_v3  ;;  %v3331_v3 = vld [vmem:[#allocation32_spill] sm:$0xff]  ;;  %v3333_v11 = vld [vmem:[#allocation30_spill] sm:$0xff] }
 0x3df   : > { %v2096_v22 = vpop.eup %2095  ;;  %v3027_v58 = vmul.f32 %v2094_v60, %v2801_v53  ;;  %v3030_v52 = vmul.f32 %v2094_v60, %v2798_v1  ;;  %v271_v1 = vld [vmem:[%s3252_s2] sm:$0xff]  ;;  %v3334_v60 = vld [vmem:[#allocation33_spill] sm:$0xff] }
 0x3e0   : > { %v1353_v45 = vmul.f32 %v2096_v22, %v2794_v33  ;;  %v1352_v31 = vmul.f32 %v2096_v22, %v2792_v57 }
 0x3e1   : > { %1493 = vmatpush1.xpose.msra.mxu0 %v1354_v59  ;;  %1853 = vmatpush1.xpose.msra.mxu1 %v1354_v59  ;;  %1407 = vst [vmem:[%s2922_s15 + $0x18] sm:$0xff] %v3027_v58  ;;  %1406 = vst [vmem:[%s2922_s15 + $0x10] sm:$0xff] %v3030_v52  ;;  %v3332_v59 = vld [vmem:[#allocation34_spill] sm:$0xff] }
 0x3e2   : > { %1417 = vst [vmem:[%s2922_s15 + $0x68] sm:$0xff] %v1353_v45  ;;  %1494 = vmatprep.subr.mxu0 %v1353_v45  ;;  %1822 = vmatprep.subr.mxu1 %v1353_v45  ;;  %1416 = vst [vmem:[%s2922_s15 + $0x60] sm:$0xff] %v1352_v31 }
 0x3e3   : > { %v2098_v53 = vpop.eup %2097  ;;  %284 = vperm.xlu1 %1942, %v272_v14  }
 0x3e4   : > { %v1349_v57 = vmul.f32 %v2098_v53, %v2810_v47  ;;  %v1348_v33 = vmul.f32 %v2098_v53, %v2803_v12 }
 0x3e5   : > { %1495 = vmatpush1.xpose.msra.mxu0 %v1352_v31  ;;  %1854 = vmatpush1.xpose.msra.mxu1 %v1352_v31  ;;  %v3336_v31 = vld [vmem:[#allocation31_spill] sm:$0xff] }
 0x3e6   : > { %1413 = vst [vmem:[%s2922_s15 + $0x48] sm:$0xff] %v1349_v57  ;;  %1412 = vst [vmem:[%s2922_s15 + $0x40] sm:$0xff] %v1348_v33  ;;  %1496 = vmatprep.subr.mxu0 %v2983_v42  ;;  %1823 = vmatprep.subr.mxu1 %v2983_v42 }
 0x3e7   : > { %v2100_v43 = vpop.eup %2099  ;;  %279 = vperm.xlu1 %1942, %v271_v1  }
 0x3e8   : > { %v1345_v47 = vmul.f32 %v2100_v43, %v2818_v36  ;;  %v1344_v12 = vmul.f32 %v2100_v43, %v2813_v49  ;;  %v1304_v38 = vpop.xlane.xlu0 %1303  ;;  %v3338_v43 = vld [vmem:[#allocation29_spill] sm:$0xff] }
 0x3e9   : > { %1497 = vmatpush1.xpose.msra.mxu0 %v2986_v34  ;;  %1855 = vmatpush1.xpose.msra.mxu1 %v2986_v34  ;;  %2103 = vrcp.f32 %v1304_v38  ;;  %v273_v34 = vld [vmem:[%s3252_s2 + $0x10] sm:$0xff] }
 0x3ea   : > { %1409 = vst [vmem:[%s2922_s15 + $0x28] sm:$0xff] %v1345_v47  ;;  %1408 = vst [vmem:[%s2922_s15 + $0x20] sm:$0xff] %v1344_v12  ;;  %1498 = vmatprep.subr.mxu0 %v1349_v57  ;;  %1824 = vmatprep.subr.mxu1 %v1349_v57 }
 0x3eb   : > { %v2102_v40 = vpop.eup %2101  ;;  %294 = vperm.xlu1 %1942, %v274_v16   ;;  %v3340_v16 = vld [vmem:[#allocation36_spill] sm:$0xff] }
 0x3ec   : > { %v1341_v49 = vmul.f32 %v2102_v40, %v2828_v21  ;;  %v1340_v36 = vmul.f32 %v2102_v40, %v2823_v37  ;;  %v1307_v42 = vpop.xlane.xlu1 %1306  ;;  %v1298_v41 = vpop.xlane.xlu0 %1297 }
 0x3ed   : > { %1499 = vmatpush1.xpose.msra.mxu0 %v1348_v33  ;;  %1856 = vmatpush1.xpose.msra.mxu1 %v1348_v33  ;;  %2105 = vrcp.f32 %v1307_v42  ;;  %v3337_v33 = vld [vmem:[#allocation35_spill] sm:$0xff] }
 0x3ee   : > { %1405 = vst [vmem:[%s2922_s15 + $0x8] sm:$0xff] %v1341_v49  ;;  %1404 = vst [vmem:[%s2922_s15] sm:$0xff] %v1340_v36  ;;  %1500 = vmatprep.subr.mxu0 %v3007_v15  ;;  %1825 = vmatprep.subr.mxu1 %v3007_v15  ;;  %2107 = vrcp.f32 %v1298_v41 }
 0x3f0   : > { %289 = vperm.xlu0 %1941, %v273_v34   ;;  %v1301_v21 = vpop.xlane.xlu1 %1300  ;;  %v1292_v0 = vpop.xlane.xlu0 %1291 }
 0x3f1   : > { %1501 = vmatpush1.xpose.msra.mxu0 %v3010_v63  ;;  %1857 = vmatpush1.xpose.msra.mxu1 %v3010_v63  ;;  %2109 = vrcp.f32 %v1301_v21 }
 0x3f2   : > { %1502 = vmatprep.subr.mxu0 %v1345_v47  ;;  %1826 = vmatprep.subr.mxu1 %v1345_v47  ;;  %2111 = vrcp.f32 %v1292_v0  ;;  %v3341_v0 = vld [vmem:[#allocation15_spill] sm:$0xff] }
 0x3f4   : > { %v1295_v37 = vpop.xlane.xlu1 %1294  ;;  %v1286_v50 = vpop.xlane.xlu0 %1285 }
 0x3f5   : > { %1503 = vmatpush1.xpose.msra.mxu0 %v1344_v12  ;;  %1858 = vmatpush1.xpose.msra.mxu1 %v1344_v12  ;;  %2113 = vrcp.f32 %v1295_v37  ;;  %v3339_v12 = vld [vmem:[#allocation37_spill] sm:$0xff] }
 0x3f6   : > { %v2104_v54 = vpop.eup %2103  ;;  %1504 = vmatprep.subr.mxu0 %v3027_v58  ;;  %1827 = vmatprep.subr.mxu1 %v3027_v58  ;;  %2115 = vrcp.f32 %v1286_v50 }
 0x3f7   : > { %v1401_v2 = vmul.f32 %v2104_v54, %v2850_v39  ;;  %v1400_v35 = vmul.f32 %v2104_v54, %v2848_v19 }
 0x3f8   : > { %v1289_v51 = vpop.xlane.xlu1 %1288 }
 0x3f9   : > { %1505 = vmatpush1.xpose.msra.mxu0 %v3030_v52  ;;  %1859 = vmatpush1.xpose.msra.mxu1 %v3030_v52  ;;  %2117 = vrcp.f32 %v1289_v51  ;;  %1465 = vst [vmem:[%s2922_s15 + $0x1e8] sm:$0xff] %v1401_v2  ;;  %1464 = vst [vmem:[%s2922_s15 + $0x1e0] sm:$0xff] %v1400_v35  ;;  %v3335_v52 = vld [vmem:[#allocation28_spill] sm:$0xff] }
 0x3fa   : > { %v2106_v55 = vpop.eup %2105  ;;  %1506 = vmatprep.subr.mxu0 %v1341_v49  ;;  %1828 = vmatprep.subr.mxu1 %v1341_v49 }
 0x3fb   : > { %v2108_v62 = vpop.eup %2107  ;;  %v1403_v15 = vmul.f32 %v2106_v55, %v2862_v30  ;;  %v1402_v19 = vmul.f32 %v2106_v55, %v2860_v9  ;;  %v3342_v55 = vld [vmem:[#allocation13_spill] sm:$0xff] }
 0x3fc   : > { %v1283_v39 = vpop.xlane.xlu1 %1282  ;;  %v1280_v63 = vpop.xlane.xlu0 %1279  ;;  %v1397_v18 = vmul.f32 %v2108_v62, %v2856_v27  ;;  %v1396_v29 = vmul.f32 %v2108_v62, %v2852_v61 }
 0x3fd   : > { %1507 = vmatpush1.xpose.msra.mxu0 %v1340_v36  ;;  %1860 = vmatpush1.xpose.msra.mxu1 %v1340_v36  ;;  %2119 = vrcp.f32 %v1283_v39  ;;  %1467 = vst [vmem:[%s2922_s15 + $0x1f8] sm:$0xff] %v1403_v15  ;;  %1466 = vst [vmem:[%s2922_s15 + $0x1f0] sm:$0xff] %v1402_v19 }
 0x3fe   : > { %v2110_v56 = vpop.eup %2109  ;;  %2121 = vrcp.f32 %v1280_v63  ;;  %1508 = vmatprep.subr.mxu0 %v1403_v15  ;;  %1829 = vmatprep.subr.mxu1 %v1403_v15  ;;  %1461 = vst [vmem:[%s2922_s15 + $0x1c8] sm:$0xff] %v1397_v18  ;;  %1460 = vst [vmem:[%s2922_s15 + $0x1c0] sm:$0xff] %v1396_v29 }
 0x3ff   : > { %v2112_v9 = vpop.eup %2111  ;;  %v1399_v27 = vmul.f32 %v2110_v56, %v2870_v7  ;;  %v1398_v61 = vmul.f32 %v2110_v56, %v2864_v23 }
 0x400   : > { %v1393_v30 = vmul.f32 %v2112_v9, %v2844_v28  ;;  %v1392_v4 = vmul.f32 %v2112_v9, %v2842_v46 }
 0x401   : > { %1509 = vmatpush2.xpose.msra.mxu0 %v1402_v19  ;;  %1861 = vmatpush2.xpose.msra.mxu1 %v1402_v19  ;;  %1463 = vst [vmem:[%s2922_s15 + $0x1d8] sm:$0xff] %v1399_v27  ;;  %1462 = vst [vmem:[%s2922_s15 + $0x1d0] sm:$0xff] %v1398_v61 }
 0x402   : > { %v2114_v13 = vpop.eup %2113  ;;  %1510 = vmatprep.subr.mxu0 %v1401_v2  ;;  %1830 = vmatprep.subr.mxu1 %v1401_v2  ;;  %1457 = vst [vmem:[%s2922_s15 + $0x1a8] sm:$0xff] %v1393_v30  ;;  %1456 = vst [vmem:[%s2922_s15 + $0x1a0] sm:$0xff] %v1392_v4 }
 0x403   : > { %v2116_v7 = vpop.eup %2115  ;;  %v1395_v23 = vmul.f32 %v2114_v13, %v3331_v3  ;;  %v1394_v28 = vmul.f32 %v2114_v13, %v3332_v59 }
 0x404   : > { %v1389_v46 = vmul.f32 %v2116_v7, %v3333_v11  ;;  %v1388_v22 = vmul.f32 %v2116_v7, %v3334_v60  ;;  %v3347_v7 = vld [vmem:[#allocation19_spill] sm:$0xff] }
 0x405   : > { %1511 = vmatpush2.xpose.msra.mxu0 %v1400_v35  ;;  %1862 = vmatpush2.xpose.msra.mxu1 %v1400_v35  ;;  %1459 = vst [vmem:[%s2922_s15 + $0x1b8] sm:$0xff] %v1395_v23  ;;  %1458 = vst [vmem:[%s2922_s15 + $0x1b0] sm:$0xff] %v1394_v28 }
 0x406   : > { %v2118_v58 = vpop.eup %2117  ;;  %1512 = vmatprep.subr.mxu0 %v1399_v27  ;;  %1831 = vmatprep.subr.mxu1 %v1399_v27  ;;  %1453 = vst [vmem:[%s2922_s15 + $0x188] sm:$0xff] %v1389_v46  ;;  %1452 = vst [vmem:[%s2922_s15 + $0x180] sm:$0xff] %v1388_v22  ;;  %v3345_v27 = vld [vmem:[#allocation17_spill] sm:$0xff] }
 0x407   : > { %v1391_v45 = vmul.f32 %v2118_v58, %v3335_v52  ;;  %v1390_v14 = vmul.f32 %v2118_v58, %v3336_v31 }
 0x409   : > { %1513 = vmatpush2.xpose.msra.mxu0 %v1398_v61  ;;  %1863 = vmatpush2.xpose.msra.mxu1 %v1398_v61  ;;  %1455 = vst [vmem:[%s2922_s15 + $0x198] sm:$0xff] %v1391_v45  ;;  %1454 = vst [vmem:[%s2922_s15 + $0x190] sm:$0xff] %v1390_v14 }
 0x40a   : > { %v2120_v53 = vpop.eup %2119  ;;  %1514 = vmatprep.subr.mxu0 %v1397_v18  ;;  %1832 = vmatprep.subr.mxu1 %v1397_v18 }
 0x40b   : > { %v2122_v57 = vpop.eup %2121  ;;  %v1387_v1 = vmul.f32 %v2120_v53, %v3337_v33  ;;  %v1386_v47 = vmul.f32 %v2120_v53, %v3338_v43 }
 0x40c   : > { %v1385_v38 = vmul.f32 %v2122_v57, %v3339_v12  ;;  %v1384_v40 = vmul.f32 %v2122_v57, %v3340_v16 }
 0x40d   : > { %1515 = vmatpush2.xpose.msra.mxu0 %v1396_v29  ;;  %1864 = vmatpush2.xpose.msra.mxu1 %v1396_v29  ;;  %1451 = vst [vmem:[%s2922_s15 + $0x178] sm:$0xff] %v1387_v1  ;;  %1450 = vst [vmem:[%s2922_s15 + $0x170] sm:$0xff] %v1386_v47 }
 0x40e   : > { %1516 = vmatprep.subr.mxu0 %v1395_v23  ;;  %1833 = vmatprep.subr.mxu1 %v1395_v23  ;;  %1449 = vst [vmem:[%s2922_s15 + $0x168] sm:$0xff] %v1385_v38  ;;  %1448 = vst [vmem:[%s2922_s15 + $0x160] sm:$0xff] %v1384_v40  ;;  %v3348_v23 = vld [vmem:[#allocation18_spill] sm:$0xff] }
 0x411   : > { %1517 = vmatpush2.xpose.msra.mxu0 %v1394_v28  ;;  %1865 = vmatpush2.xpose.msra.mxu1 %v1394_v28 }
 0x412   : > { %1518 = vmatprep.subr.mxu0 %v1393_v30  ;;  %1834 = vmatprep.subr.mxu1 %v1393_v30 }
 0x415   : > { %1519 = vmatpush2.xpose.msra.mxu0 %v1392_v4  ;;  %1866 = vmatpush2.xpose.msra.mxu1 %v1392_v4  ;;  %v3346_v4 = vld [vmem:[#allocation16_spill] sm:$0xff] }
 0x416   : > { %1520 = vmatprep.subr.mxu0 %v1391_v45  ;;  %1835 = vmatprep.subr.mxu1 %v1391_v45 }
 0x419   : > { %1521 = vmatpush2.xpose.msra.mxu0 %v1390_v14  ;;  %1867 = vmatpush2.xpose.msra.mxu1 %v1390_v14 }
 0x41a   : > { %1522 = vmatprep.subr.mxu0 %v1389_v46  ;;  %1836 = vmatprep.subr.mxu1 %v1389_v46 }
 0x41d   : > { %1523 = vmatpush2.xpose.msra.mxu0 %v1388_v22  ;;  %1868 = vmatpush2.xpose.msra.mxu1 %v1388_v22 }
 0x41e   : > { %1524 = vmatprep.subr.mxu0 %v1387_v1  ;;  %1837 = vmatprep.subr.mxu1 %v1387_v1 }
 0x421   : > { %1525 = vmatpush2.xpose.msra.mxu0 %v1386_v47  ;;  %1869 = vmatpush2.xpose.msra.mxu1 %v1386_v47 }
 0x422   : > { %1526 = vmatprep.subr.mxu0 %v1385_v38  ;;  %1838 = vmatprep.subr.mxu1 %v1385_v38 }
 0x425   : > { %1527 = vmatpush2.xpose.msra.mxu0 %v1384_v40  ;;  %1870 = vmatpush2.xpose.msra.mxu1 %v1384_v40 }
 0x453   : > { %v1277_v49 = vpop.xlane.xlu1 %1276 }
 0x454   : > { %2123 = vrcp.f32 %v1277_v49 }
 0x457   : > { %v1271_v36 = vpop.xlane.xlu1 %1270 }
 0x458   : > { %2125 = vrcp.f32 %v1271_v36 }
 0x45b   : > { %v1265_v42 = vpop.xlane.xlu1 %1264  ;;  %v1274_v41 = vpop.xlane.xlu0 %1273 }
 0x45c   : > { %2127 = vrcp.f32 %v1265_v42 }
 0x45d   : > { %2129 = vrcp.f32 %v1274_v41 }
 0x45f   : > { %v3116_v34 = vpop.permute.xlu1 %284  ;;  %v1268_v21 = vpop.xlane.xlu0 %1267 }
 0x460   : > { %v401_v37 = vadd.f32 %v3341_v0, %v3116_v34  ;;  %2131 = vrcp.f32 %v1268_v21 }
 0x461   : > { %v2124_v50 = vpop.eup %2123 }
 0x462   : > { %1546 = vmatprep.mubr.f32.mxu1 %v401_v37  ;;  %v1383_v54 = vmul.f32 %v2124_v50, %v2956_v6  ;;  %v1382_v2 = vmul.f32 %v2124_v50, %v2952_v10 }
 0x463   : > { %v280_v35 = vpop.permute.xlu1 %279  ;;  %v1262_v51 = vpop.xlane.xlu0 %1261 }
 0x464   : > { %v395_v62 = vadd.f32 %v3342_v55, %v280_v35  ;;  %2133 = vrcp.f32 %v1262_v51  ;;  %1447 = vst [vmem:[%s2922_s15 + $0x158] sm:$0xff] %v1383_v54  ;;  %1528 = vmatprep.subr.mxu0 %v1383_v54  ;;  %1839 = vmatprep.subr.mxu1 %v1383_v54  ;;  %1446 = vst [vmem:[%s2922_s15 + $0x150] sm:$0xff] %v1382_v2 }
 0x465   : > { %v2126_v15 = vpop.eup %2125  ;;  %1529 = vmatpush2.xpose.msra.mxu0 %v1382_v2  ;;  %1871 = vmatpush2.xpose.msra.mxu1 %v1382_v2 }
 0x466   : > { %1540 = vmatprep.mubr.f32.mxu0 %v395_v62  ;;  %v1379_v6 = vmul.f32 %v2126_v15, %v2950_v44  ;;  %v1378_v10 = vmul.f32 %v2126_v15, %v2946_v25 }
 0x467   : > { %v295_v30 = vpop.permute.xlu1 %294 }
 0x468   : > { %1443 = vst [vmem:[%s2922_s15 + $0x138] sm:$0xff] %v1379_v6  ;;  %1442 = vst [vmem:[%s2922_s15 + $0x130] sm:$0xff] %v1378_v10  ;;  %v413_v3 = vadd.f32 %v3347_v7, %v295_v30  ;;  %v411_v59 = vadd.f32 %v3348_v23, %v295_v30 }
 0x469   : > { %v2128_v19 = vpop.eup %2127 }
 0x46a   : > { %v2130_v39 = vpop.eup %2129  ;;  %v1375_v63 = vmul.f32 %v2128_v19, %v2972_v26  ;;  %v1374_v18 = vmul.f32 %v2128_v19, %v2966_v48 }
 0x46b   : > { %v1381_v29 = vmul.f32 %v2130_v39, %v2976_v24  ;;  %v1380_v56 = vmul.f32 %v2130_v39, %v2974_v5 }
 0x46c   : > { %1439 = vst [vmem:[%s2922_s15 + $0x118] sm:$0xff] %v1375_v63  ;;  %1438 = vst [vmem:[%s2922_s15 + $0x110] sm:$0xff] %v1374_v18 }
 0x46d   : > { %v2132_v44 = vpop.eup %2131  ;;  %1445 = vst [vmem:[%s2922_s15 + $0x148] sm:$0xff] %v1381_v29  ;;  %1530 = vmatprep.subr.mxu0 %v1381_v29  ;;  %1840 = vmatprep.subr.mxu1 %v1381_v29  ;;  %1444 = vst [vmem:[%s2922_s15 + $0x140] sm:$0xff] %v1380_v56 }
 0x46e   : > { %1531 = vmatpush2.xpose.msra.mxu0 %v1380_v56  ;;  %1872 = vmatpush2.xpose.msra.mxu1 %v1380_v56  ;;  %v1377_v25 = vmul.f32 %v2132_v44, %v2964_v32  ;;  %v1376_v48 = vmul.f32 %v2132_v44, %v2960_v20  ;;  %v290_v20 = vpop.permute.xlu0 %289  ;;  %v3343_v32 = vld [vmem:[#allocation14_spill] sm:$0xff] }
 0x46f   : > { %1532 = vmatprep.subr.mxu0 %v1379_v6  ;;  %1841 = vmatprep.subr.mxu1 %v1379_v6  ;;  %v407_v61 = vadd.f32 %v3345_v27, %v290_v20  ;;  %v405_v13 = vadd.f32 %v3346_v4, %v290_v20 }
 0x470   : > { %1441 = vst [vmem:[%s2922_s15 + $0x128] sm:$0xff] %v1377_v25  ;;  %1440 = vst [vmem:[%s2922_s15 + $0x120] sm:$0xff] %v1376_v48 }
 0x471   : > { %v2134_v26 = vpop.eup %2133 }
 0x472   : > { %1533 = vmatpush2.xpose.msra.mxu0 %v1378_v10  ;;  %1873 = vmatpush2.xpose.msra.mxu1 %v1378_v10  ;;  %v1373_v5 = vmul.f32 %v2134_v26, %v3002_v17  ;;  %v1372_v24 = vmul.f32 %v2134_v26, %v2996_v8  ;;  %v399_v8 = vadd.f32 %v3343_v32, %v3116_v34  ;;  %v3344_v17 = vld [vmem:[#allocation12_spill] sm:$0xff] }
 0x473   : > { %1534 = vmatprep.subr.mxu0 %v1377_v25  ;;  %1842 = vmatprep.subr.mxu1 %v1377_v25  ;;  %v393_v9 = vadd.f32 %v3344_v17, %v280_v35 }
 0x474   : > { %1437 = vst [vmem:[%s2922_s15 + $0x108] sm:$0xff] %v1373_v5  ;;  %1436 = vst [vmem:[%s2922_s15 + $0x100] sm:$0xff] %v1372_v24  ;;  %s2141_s15 = scalar_lea.vmem %s2140_s3, 16384 }
 0x475   : > { %p2143_p2 = scmp.lt.s32.totalorder %s2141_s15, %s2135_s18 }
 0x476   : > { %1535 = vmatpush2.xpose.msra.mxu0 %v1376_v48  ;;  %1874 = vmatpush2.xpose.msra.mxu1 %v1376_v48 }
 0x477   : > { %1536 = vmatprep.subr.mxu0 %v1375_v63  ;;  %1843 = vmatprep.subr.mxu1 %v1375_v63  ;;  %p2144_p3 = por %p2143_p2, %p2142_p1 }
 0x479   : > { %p2145_p5 = pnand %p2144_p3, %p2138_p0 }
 0x47a   : > { %1537 = vmatpush2.xpose.msra.mxu0 %v1374_v18  ;;  %1875 = vmatpush2.xpose.msra.mxu1 %v1374_v18 }
 0x47b   : > { %1538 = vmatprep.subr.mxu0 %v1373_v5  ;;  %1844 = vmatprep.subr.mxu1 %v1373_v5 }
 0x47e   : > { %1539 = vmatpush2.xpose.msra.mxu0 %v1372_v24  ;;  %1876 = vmatpush2.xpose.msra.mxu1 %v1372_v24 }
 0x481   : > { %1541 = vmatmul.mubr.f32.vlgmr.msra.gmra.mxu0 %v393_v9  ;;  %1547 = vmatmul.mubr.f32.vlgmr.msra.gmra.mxu1 %v399_v8 }
 0x482   : > { %1552 = vmatprep.mubr.f32.mxu1 %v407_v61 }
 0x485   : > { %1553 = vmatmul.mubr.f32.gmra.mxu1 %v405_v13 }
 0x486   : > { %1558 = vmatprep.mubr.f32.mxu1 %v413_v3 }
 0x489   : > { %1559 = vmatmul.mubr.f32.gmra.mxu1 %v411_v59 }
 0x48a   : > { %2148 = shalt.err (!%p2145_p5)
}
 0x48b   : > { %s2149_s26 = scalar_lea.hbm %s3157_s14, 8192  ;;  %s2153_s8 = scalar_lea.hbm %s3255_s5, 16384 }
 0x48c   : > { %p2150_p6 = scmp.ne.s32.totalorder %s3157_s14, %s2149_s26  ;;  %p2154_p10 = scmp.lt.s32.totalorder %s3157_s14, %s3255_s5 }
 0x48d   : > { %p2155_p11 = scmp.lt.s32.totalorder %s2153_s8, %s2149_s26 }
 0x48e   : > { %p2151_p7 = pnand %p2150_p6, %p2322_p4 }
 0x48f   : > { %p2156_p12 = por %p2155_p11, %p2154_p10 }
 0x490   : > { %p2152_p9 = pneg %p2151_p7 }
 0x492   : > { %p2157_p13 = pnand %p2156_p12, %p2152_p9 }
 0x494   : > { %2160 = shalt.err (!%p2157_p13)
}
 0x495   : > { %s2246_s12 = smov 256   ;;  %s2247_s18 = smov 16   ;;  %v1570_v46 = vld [vmem:[%s2351_s16] sm:$0xff]  ;;  %v1572_v22 = vld [vmem:[%s2351_s16 + $0x10] sm:$0xff]  ;;  %v1571_v31 = vld [vmem:[%s2351_s16 + $0x8] sm:$0xff] }
 0x496   : > { %1878 = dma.vmem_to_hbm [thread:$0]  (%p2322_p4), %s3159_s10, 8192, %s3157_s14, %s1609_s17, %s2246_s12, %s2246_s12, %s2247_s18  }
 0x497   : > { %s1565_s19 = sld [smem:[#allocation5]]  ;;  %s1760_s3 = sshll.u32 %s2907_s13, 6  ;;  %v1573_v53 = vld [vmem:[%s2351_s16 + $0x18] sm:$0xff]  ;;  %v1574_v12 = vld [vmem:[%s2351_s16 + $0x20] sm:$0xff]  ;;  %v1575_v36 = vld [vmem:[%s2351_s16 + $0x28] sm:$0xff] }
 0x498   : > { %s238_s10 = scalar_lea.vmem [#allocation6], %s1760_s3  ;;  %v1576_v21 = vld [vmem:[%s2351_s16 + $0x30] sm:$0xff]  ;;  %v1577_v54 = vld [vmem:[%s2351_s16 + $0x38] sm:$0xff]  ;;  %s1811_s14 = sshll.u32 %s2233_s23, 10 }
 0x499   : > { %s1624_s17 = sshll.u32 %s238_s10, 4  ;;  %s3200_s28 = scalar_lea.hbm %s3254_s4, %s1811_s14  ;;  %s3202_s17 = int_to_ptr.vmem [resolvable:$true] %s1624_s17 }
 0x49a   : > { %s1604_s30 = scalar_lea.sflag [#allocation7], %s2907_s13  ;;  %s2161_s16 = scalar_lea.vmem %s3202_s17, 1024 }
 0x49b   : > { %p2162_p0 = scmp.ne.s32.totalorder %s3202_s17, %s2161_s16  ;;  %s2248_s23 = smov [#allocation6]  }
 0x49c   : > { %s2165_s8 = sshll.u32 %s2248_s23, 4  ;;  %s2166_s8 = int_to_ptr.vmem [resolvable:$false] %s2165_s8 }
 0x49d   : > { %v1578_v28 = vstv %s1565_s19  ;;  %p2163_p1 = pnand %p2162_p0, %p2322_p4  ;;  %s2167_s9 = scalar_lea.vmem %s2166_s8, 2048 }
 0x49e   : > { %p2168_p3 = scmp.lt.s32.totalorder %s3202_s17, %s2166_s8  ;;  %p2169_p5 = scmp.lt.s32.totalorder %s2167_s9, %s2161_s16 }
 0x49f   : > { %p2164_p2 = pneg %p2163_p1 }
 0x4a0   : > { %p2170_p6 = por %p2169_p5, %p2168_p3 }
 0x4a2   : > { %p2171_p7 = pnand %p2170_p6, %p2164_p2 }
 0x541   : > { %v1542_v11 = vpop.f32.mrf.mxu0  ;;  %v1548_v60 = vpop.f32.mrf.mxu1 }
 0x542   : > { %v1579_v58 = vmul.f32 %v1578_v28, %v1542_v11  ;;  %v1581_v52 = vmul.f32 %v1578_v28, %v1548_v60 }
 0x543   : > { %v1544_v45 = vpop.f32.mrf.mxu0  ;;  %v1550_v14 = vpop.f32.mrf.mxu1 }
 0x544   : > { %v1587_v57 = vadd.f32 %v1579_v58, %v1570_v46  ;;  %v1589_v33 = vadd.f32 %v1581_v52, %v1572_v22  ;;  %v1580_v1 = vmul.f32 %v1578_v28, %v1544_v45  ;;  %v1582_v43 = vmul.f32 %v1578_v28, %v1550_v14 }
 0x545   : > { %v1554_v47 = vpop.f32.mrf.mxu1 }
 0x546   : > { %1595 = vst [vmem:[%s238_s10] sm:$0xff] %v1587_v57  ;;  %1597 = vst [vmem:[%s238_s10 + $0x10] sm:$0xff] %v1589_v33  ;;  %v1588_v38 = vadd.f32 %v1580_v1, %v1571_v31  ;;  %v1590_v16 = vadd.f32 %v1582_v43, %v1573_v53  ;;  %v1583_v40 = vmul.f32 %v1578_v28, %v1554_v47 }
 0x547   : > { %v1556_v49 = vpop.f32.mrf.mxu1 }
 0x548   : > { %1596 = vst [vmem:[%s238_s10 + $0x8] sm:$0xff] %v1588_v38  ;;  %1598 = vst [vmem:[%s238_s10 + $0x18] sm:$0xff] %v1590_v16  ;;  %v1591_v42 = vadd.f32 %v1583_v40, %v1574_v12  ;;  %v1584_v41 = vmul.f32 %v1578_v28, %v1556_v49 }
 0x549   : > { %v1560_v34 = vpop.f32.mrf.mxu1 }
 0x54a   : > { %1599 = vst [vmem:[%s238_s10 + $0x20] sm:$0xff] %v1591_v42  ;;  %v1592_v0 = vadd.f32 %v1584_v41, %v1575_v36  ;;  %v1585_v37 = vmul.f32 %v1578_v28, %v1560_v34 }
 0x54b   : > { %v1562_v50 = vpop.f32.mrf.mxu1 }
 0x54c   : > { %1600 = vst [vmem:[%s238_s10 + $0x28] sm:$0xff] %v1592_v0  ;;  %v1593_v2 = vadd.f32 %v1585_v37, %v1576_v21  ;;  %v1586_v35 = vmul.f32 %v1578_v28, %v1562_v50 }
 0x54e   : > { %1601 = vst [vmem:[%s238_s10 + $0x30] sm:$0xff] %v1593_v2  ;;  %v1594_v51 = vadd.f32 %v1586_v35, %v1577_v54 }
 0x550   : > { %1602 = vst [vmem:[%s238_s10 + $0x38] sm:$0xff] %v1594_v51 }
 0x551   : > { %2174 = shalt.err (!%p2171_p7)
}
 0x552   : > { %s2175_s11 = scalar_lea.hbm %s3200_s28, 1024  ;;  %s2179_s3 = scalar_lea.hbm %s3254_s4, 2048 }
 0x553   : > { %p2176_p9 = scmp.ne.s32.totalorder %s3200_s28, %s2175_s11  ;;  %p2180_p12 = scmp.lt.s32.totalorder %s3200_s28, %s3254_s4 }
 0x554   : > { %p2181_p13 = scmp.lt.s32.totalorder %s2179_s3, %s2175_s11 }
 0x555   : > { %p2177_p10 = pnand %p2176_p9, %p2322_p4 }
 0x556   : > { %p2182_p0 = por %p2181_p13, %p2180_p12 }
 0x557   : > { %p2178_p11 = pneg %p2177_p10 }
 0x559   : > { %p2183_p1 = pnand %p2182_p0, %p2178_p11 }
 0x55b   : > { %2186 = shalt.err (!%p2183_p1)
}
 0x55c   : > { %1877 = dma.vmem_to_hbm [thread:$0]  (%p2322_p4), %s3202_s17, 1024, %s3200_s28, %s1604_s30, %s2246_s12, %s2246_s12, %s2247_s18  }
 0x55d PF: > { %p1888_p2 = scmp.ge.s32.totalorder %s2241_s25, 2  ;;  %s1658_s15 = sand.u32 1, %s2221_s20  }
 0x55e   : > { %s1659_s26 = scalar_lea.sflag [#allocation7], %s1658_s15 }
 0x55f   : > { %p1882_p3 = pnand %p1888_p2, %p2329_p8 }
 0x561   : > { %p1883_p5 = pneg %p1882_p3 }
 0x563   : > { %2212 = dma.done.wait (%p1883_p5), %s1659_s26, 1024  }
 0x564   : > { %2214 = vsyncadd (%p1883_p5), %s1659_s26, 4294966272  ;;  %s1668_s16 = scalar_lea.sflag [#allocation9], %s1658_s15 }
 0x565   : > { %2216 = dma.done.wait (%p1883_p5), %s1668_s16, 8192  }
 0x566   : > { %2218 = vsyncadd (%p1883_p5), %s1668_s16, 4294959104  ;;  %s23_s25 = sadd.s32 1, %s2241_s25   ;;  %s3349_s20 = smov %s2225_s21 }
 0x567   : > { %p20_p6 = scmp.ge.s32.totalorder %s23_s25, 4   ;;  %s3350_s21 = smov %s2229_s22 }
 0x568   : > { %s3351_s22 = smov %s2335_s7  ;;  %s3352_s23 = smov %s2237_s24 }
 0x569   : > { %s3353_s24 = smov %s3355_s27  ;;  %22 = sbr.rel (!%p20_p6) target bundleno = 8 (0x8), region = 94 }
 0x56e   :  { %1673 = vsyncpa [#allocation7], 1 }
 0x56f   :  { %1675 = vsyncpa [#allocation7 + $0x1], 1 }
 0x570   :  { %1676 = vsyncpa [#allocation9], 1 }
 0x571   :  { %1678 = vsyncpa [#allocation9 + $0x1], 1 }

</bundles_post_ra>
